<compile_context>
chip_gen: v6e
topology: v6e:2x2x1
jax: 0.10.0
libtpu: 0.0.40
codegen_flags: <defaults>
</compile_context>

<pallas_src>
import jax
import jax.numpy as jnp
from jax.experimental import pallas as pl
from jax.experimental.pallas import tpu as pltpu


# ---------------------------------------------------------------------------
# Helpers
# ---------------------------------------------------------------------------
def _pick_cout_tile(cout, cap=256):
    """Full Cout if small, else a 128-multiple divisor <= cap (lane-dense)."""
    if cout <= cap:
        return cout
    for t in range(cap, 127, -128):
        if cout % t == 0:
            return t
    return cout


def _make_phases(x, stride):
    """Phase-decompose an NHWC activation so that a strided 3x3 conv becomes
    unit-stride taps over a small set of planes (1 plane for s=1, 4 for s=2).

    Returns (phases, geo):
      phases: (N, n_phases, Ho, Wo, C)
      geo:    static geometry consumed by the kernel (python data).
    Each phase plane is placed at `phase_offsets[p]` inside a zero-padded
    (Ho+pad_h, Wo+pad_w) VMEM plane; tap t=(kh*3+kw) reads plane taps[t][0]
    at window start (taps[t][1], taps[t][2]).
    """
    n, h, w, c = x.shape
    if stride == 1:
        phases = x[:, None]                               # (N, 1, H, W, C)
        geo = dict(
            phase_offsets=((1, 1),), pad_h=2, pad_w=2,
            taps=tuple((0, kh, kw) for kh in range(3) for kw in range(3)),
            sc_phase=0)
    elif stride == 2:
        assert h % 2 == 0 and w % 2 == 0, "stride-2 path requires even H, W"
        planes = [x[:, 1::2, 1::2, :], x[:, 1::2, 0::2, :],
                  x[:, 0::2, 1::2, :], x[:, 0::2, 0::2, :]]
        phases = jnp.stack(planes, axis=1)                 # (N, 4, H/2, W/2, C)
        geo = dict(
            phase_offsets=((1, 1), (1, 0), (0, 1), (0, 0)), pad_h=1, pad_w=1,
            taps=tuple((2 * (kh % 2) + (kw % 2), kh // 2, kw // 2)
                       for kh in range(3) for kw in range(3)),
            sc_phase=3)
    else:
        raise NotImplementedError("stride must be 1 or 2")
    return phases, geo


# ---------------------------------------------------------------------------
# Fused kernel: BN affine + ReLU + 3x3 conv (+ optional residual add,
# + optional fused 1x1 shortcut from the same resident activation).
# One invocation per (image, Cout-tile); all 9 taps done in-kernel.
# ---------------------------------------------------------------------------
def _make_conv_kernel(*, n_phases, phase_offsets, taps, ho, wo, cin,
                      has_res, has_sc, sc_phase, cdtype):

    def kernel(*refs):
        pad_ref, acc_ref = refs[-2], refs[-1]
        x_ref, scale_ref, shift_ref, w_ref = refs[0], refs[1], refs[2], refs[3]
        i = 4
        res_ref = None
        if has_res:
            res_ref = refs[i]
            i += 1
        wsc_ref = None
        if has_sc:
            wsc_ref = refs[i]
            i += 1
        o_ref = refs[i]
        sc_o_ref = refs[i + 1] if has_sc else None

        scale = scale_ref[...]                                   # (1, Cin) f32
        shift = shift_ref[...]

        # Zero-padded activation scratch (the conv's zero padding lives in
        # post-BN/ReLU space, so it must be built after the affine).
        pad_ref[...] = jnp.zeros_like(pad_ref)

        a_sc = None
        for p in range(n_phases):
            xa = x_ref[0, p].astype(jnp.float32)                 # (Ho, Wo, Cin)
            a = jnp.maximum(xa * scale + shift, 0.0)             # fused BN + ReLU
            oh, ow = phase_offsets[p]
            pad_ref[p, oh:oh + ho, ow:ow + wo, :] = a
            if has_sc and p == sc_phase:
                a_sc = a

        # 9 shifted-tap MXU matmuls, f32 accumulation, weights fully resident.
        acc_ref[...] = jnp.zeros_like(acc_ref)
        for t, (p, rh, rw) in enumerate(taps):
            tap = pad_ref[p, rh:rh + ho, rw:rw + wo, :]
            tap2d = tap.reshape(ho * wo, cin).astype(cdtype)
            acc_ref[...] += jnp.dot(tap2d, w_ref[t],
                                    preferred_element_type=jnp.float32)

        out = acc_ref[...].reshape(ho, wo, -1)
        if has_res:
            out = out + res_ref[0].astype(jnp.float32)           # fused residual
        o_ref[0] = out.astype(o_ref.dtype)

        if has_sc:
            sc = jnp.dot(a_sc.reshape(ho * wo, cin).astype(cdtype), wsc_ref[...],
                         preferred_element_type=jnp.float32)
            sc_o_ref[0] = sc.reshape(ho, wo, -1).astype(sc_o_ref.dtype)

    return kernel


def _fused_conv3x3(phases, scale, shift, w9, geo, *, w_sc=None, residual=None,
                   out_dtype, cdtype):
    n, n_phases, ho, wo, cin = phases.shape
    cout = w9.shape[-1]
    tc = _pick_cout_tile(cout)
    n_ct = cout // tc
    has_sc = w_sc is not None
    has_res = residual is not None

    in_specs = [
        pl.BlockSpec((1, n_phases, ho, wo, cin), lambda ni, ci: (ni, 0, 0, 0, 0)),
        pl.BlockSpec((1, cin), lambda ni, ci: (0, 0)),
        pl.BlockSpec((1, cin), lambda ni, ci: (0, 0)),
        pl.BlockSpec((9, cin, tc), lambda ni, ci: (0, 0, ci)),
    ]
    operands = [phases,
                scale.reshape(1, cin).astype(jnp.float32),
                shift.reshape(1, cin).astype(jnp.float32),
                w9]
    if has_res:
        in_specs.append(pl.BlockSpec((1, ho, wo, tc), lambda ni, ci: (ni, 0, 0, ci)))
        operands.append(residual)
    if has_sc:
        in_specs.append(pl.BlockSpec((cin, tc), lambda ni, ci: (0, ci)))
        operands.append(w_sc)

    out_block = pl.BlockSpec((1, ho, wo, tc), lambda ni, ci: (ni, 0, 0, ci))
    if has_sc:
        out_specs = [out_block, out_block]
        out_shape = (jax.ShapeDtypeStruct((n, ho, wo, cout), out_dtype),
                     jax.ShapeDtypeStruct((n, ho, wo, cout), out_dtype))
    else:
        out_specs = out_block
        out_shape = jax.ShapeDtypeStruct((n, ho, wo, cout), out_dtype)

    kernel = _make_conv_kernel(
        n_phases=n_phases, phase_offsets=geo["phase_offsets"], taps=geo["taps"],
        ho=ho, wo=wo, cin=cin, has_res=has_res, has_sc=has_sc,
        sc_phase=geo["sc_phase"], cdtype=cdtype)

    return pl.pallas_call(
        kernel,
        out_shape=out_shape,
        grid_spec=pltpu.PrefetchScalarGridSpec(
            num_scalar_prefetch=0,
            grid=(n, n_ct),
            in_specs=in_specs,
            out_specs=out_specs,
            scratch_shapes=[
                pltpu.VMEM((n_phases, ho + geo["pad_h"], wo + geo["pad_w"], cin),
                           jnp.float32),
                pltpu.VMEM((ho * wo, tc), jnp.float32),
            ]),
        compiler_params=pltpu.CompilerParams(
            dimension_semantics=("parallel", "parallel"),
            vmem_limit_bytes=64 * 1024 * 1024),
    )(*operands)


# ---------------------------------------------------------------------------
# Full BasicBlock forward (NCHW in / NCHW out).
# ---------------------------------------------------------------------------
def basic_block_forward(x_nchw, params, stride, drop_rate=0.0, eps=1e-5,
                        compute_dtype=jnp.bfloat16):
    if drop_rate > 0.0:
        # TODO(synk): F.dropout (droprate > 0) not implemented in the Pallas path.
        raise NotImplementedError("drop_rate > 0 is not supported")

    n, cin, h, w = x_nchw.shape
    x = jnp.transpose(x_nchw, (0, 2, 3, 1))                  # NHWC: C on lanes
    x32 = x.astype(jnp.float32)
    equal_in_out = params["w_sc"] is None
    cout = params["w1"].shape[-1]

    # bn1 (training-mode batch stats) folded to a per-channel affine; the
    # affine + ReLU is applied inside the conv1 kernel.
    # TODO(synk): eval-mode running_mean/running_var is not implemented.
    mean1 = jnp.mean(x32, axis=(0, 1, 2))
    var1 = jnp.var(x32, axis=(0, 1, 2))
    scale1 = params["gamma1"] / jnp.sqrt(var1 + eps)
    shift1 = params["beta1"] - mean1 * scale1

    # conv1: 3x3/stride with fused bn1+relu1; when in!=out the 1x1 shortcut is
    # computed in the same kernel from the VMEM-resident activation.
    phases1, geo1 = _make_phases(x.astype(compute_dtype), stride)
    w1 = params["w1"].reshape(9, cin, cout).astype(compute_dtype)
    w_sc = None if equal_in_out else params["w_sc"].astype(compute_dtype)
    r1 = _fused_conv3x3(phases1, scale1, shift1, w1, geo1, w_sc=w_sc,
                        residual=None, out_dtype=compute_dtype,
                        cdtype=compute_dtype)
    if equal_in_out:
        c1, res = r1, x                                      # identity residual
    else:
        c1, res = r1                                         # fused 1x1 shortcut

    # bn2 (training-mode batch stats over the conv1 output).
    # TODO(synk): fold sum / sum-of-squares into conv1's epilogue to avoid
    # this extra HBM read of c1.
    c1_32 = c1.astype(jnp.float32)
    mean2 = jnp.mean(c1_32, axis=(0, 1, 2))
    var2 = jnp.var(c1_32, axis=(0, 1, 2))
    scale2 = params["gamma2"] / jnp.sqrt(var2 + eps)
    shift2 = params["beta2"] - mean2 * scale2

    # conv2: 3x3/stride-1 with fused bn2+relu2 and the residual add fused into
    # the epilogue (block output written to HBM exactly once).
    phases2, geo2 = _make_phases(c1, 1)
    w2 = params["w2"].reshape(9, cout, cout).astype(compute_dtype)
    out = _fused_conv3x3(phases2, scale2, shift2, w2, geo2, w_sc=None,
                         residual=res, out_dtype=x_nchw.dtype,
                         cdtype=compute_dtype)

    return jnp.transpose(out, (0, 3, 1, 2))                  # back to NCHW


# ---------------------------------------------------------------------------
# Pure-JAX reference (same training-mode BN semantics) for verification.
# ---------------------------------------------------------------------------
def _ref_basic_block(x, p, stride, eps=1e-5):
    def bn_train(z, gamma, beta):
        mean = jnp.mean(z, axis=(0, 2, 3), keepdims=True)
        var = jnp.var(z, axis=(0, 2, 3), keepdims=True)
        return (z - mean) / jnp.sqrt(var + eps) * gamma.reshape(1, -1, 1, 1) \
            + beta.reshape(1, -1, 1, 1)

    def conv(z, w_hwio, s, pad):
        w_oihw = jnp.transpose(w_hwio, (3, 2, 0, 1))
        return jax.lax.conv_general_dilated(
            z, w_oihw, (s, s), [(pad, pad), (pad, pad)],
            dimension_numbers=("NCHW", "OIHW", "NCHW"),
            precision=jax.lax.Precision.HIGHEST)

    equal = p["w_sc"] is None
    xa = jax.nn.relu(bn_train(x, p["gamma1"], p["beta1"]))
    h = conv(xa, p["w1"], stride, 1)
    h = jax.nn.relu(bn_train(h, p["gamma2"], p["beta2"]))
    h = conv(h, p["w2"], 1, 1)
    if equal:
        res = x
    else:
        w_sc_hwio = p["w_sc"].reshape(1, 1, *p["w_sc"].shape)
        res = conv(xa, w_sc_hwio, stride, 0)
    return res + h


if __name__ == "__main__":
    key = jax.random.PRNGKey(0)
    ks = jax.random.split(key, 10)

    # ---- Config A: not equalInOut (fused 1x1 shortcut), stride 2 ----
    N, Cin, H, W, Cout, stride = 2, 4, 16, 16, 8, 2
    x = jax.random.normal(ks[0], (N, Cin, H, W), dtype=jnp.float32)
    params = {
        "gamma1": 1.0 + 0.1 * jax.random.normal(ks[1], (Cin,), jnp.float32),
        "beta1": 0.1 * jax.random.normal(ks[2], (Cin,), jnp.float32),
        "w1": 0.2 * jax.random.normal(ks[3], (3, 3, Cin, Cout), jnp.float32),
        "gamma2": 1.0 + 0.1 * jax.random.normal(ks[4], (Cout,), jnp.float32),
        "beta2": 0.1 * jax.random.normal(ks[5], (Cout,), jnp.float32),
        "w2": 0.2 * jax.random.normal(ks[6], (3, 3, Cout, Cout), jnp.float32),
        "w_sc": 0.2 * jax.random.normal(ks[7], (Cin, Cout), jnp.float32),
    }
    ref = _ref_basic_block(x, params, stride)

    out = basic_block_forward(x, params, stride, compute_dtype=jnp.float32)
    jax.block_until_ready(out)
    assert out.shape == (N, Cout, H // stride, W // stride)
    assert jnp.allclose(out, ref, atol=2e-3, rtol=2e-3), \
        float(jnp.max(jnp.abs(out - ref)))

    out_bf = basic_block_forward(x, params, stride)       # default bf16 MXU path
    jax.block_until_ready(out_bf)
    assert jnp.allclose(out_bf, ref, atol=1e-1, rtol=1e-1), \
        float(jnp.max(jnp.abs(out_bf - ref)))

    # ---- Config B: equalInOut (identity shortcut), stride 1 ----
    Cb = 8
    xb = jax.random.normal(ks[8], (N, Cb, H, W), dtype=jnp.float32)
    params_b = {
        "gamma1": jnp.ones((Cb,), jnp.float32),
        "beta1": jnp.zeros((Cb,), jnp.float32),
        "w1": 0.2 * jax.random.normal(ks[9], (3, 3, Cb, Cb), jnp.float32),
        "gamma2": jnp.ones((Cb,), jnp.float32),
        "beta2": jnp.zeros((Cb,), jnp.float32),
        "w2": 0.2 * jax.random.normal(ks[3], (3, 3, Cb, Cb), jnp.float32),
        "w_sc": None,
    }
    ref_b = _ref_basic_block(xb, params_b, 1)

    out_b = basic_block_forward(xb, params_b, 1, compute_dtype=jnp.float32)
    jax.block_until_ready(out_b)
    assert out_b.shape == (N, Cb, H, W)
    assert jnp.allclose(out_b, ref_b, atol=2e-3, rtol=2e-3), \
        float(jnp.max(jnp.abs(out_b - ref_b)))

    out_b_bf = basic_block_forward(xb, params_b, 1)       # default bf16 MXU path
    jax.block_until_ready(out_b_bf)
    assert jnp.allclose(out_b_bf, ref_b, atol=1e-1, rtol=1e-1), \
        float(jnp.max(jnp.abs(out_b_bf - ref_b)))

    print("KERNEL_OK")
</pallas_src>

<mosaic_0001>
module attributes {stable_mosaic.version = 11 : i64} {
  func.func @kernel(%arg0: i32, %arg1: i32, %arg2: memref<1x4x8x8x4xf32, #tpu.memory_space<vmem>>, %arg3: memref<1x4xf32, #tpu.memory_space<vmem>>, %arg4: memref<1x4xf32, #tpu.memory_space<vmem>>, %arg5: memref<9x4x8xf32, #tpu.memory_space<vmem>>, %arg6: memref<4x8xf32, #tpu.memory_space<vmem>>, %arg7: memref<1x8x8x8xf32, #tpu.memory_space<vmem>>, %arg8: memref<1x8x8x8xf32, #tpu.memory_space<vmem>>, %arg9: memref<4x9x9x4xf32, #tpu.memory_space<vmem>>, %arg10: memref<64x8xf32, #tpu.memory_space<vmem>>) attributes {dimension_semantics = [#tpu.dimension_semantics<parallel>, #tpu.dimension_semantics<parallel>], iteration_bounds = array<i64: 2, 1>, scalar_prefetch = 0 : i64, scratch_operands = 2 : i64, tpu.core_type = #tpu.core_type<tc>, window_params = [{transform_indices = @transform_0, window_bounds = array<i64: 1, 4, 8, 8, 4>}, {pipeline_mode = #tpu.pipeline_mode<synchronous>, transform_indices = @transform_1, window_bounds = array<i64: 1, 4>}, {pipeline_mode = #tpu.pipeline_mode<synchronous>, transform_indices = @transform_2, window_bounds = array<i64: 1, 4>}, {transform_indices = @transform_3, window_bounds = array<i64: 9, 4, 8>}, {transform_indices = @transform_4, window_bounds = array<i64: 4, 8>}, {transform_indices = @transform_5, window_bounds = array<i64: 1, 8, 8, 8>}, {transform_indices = @transform_6, window_bounds = array<i64: 1, 8, 8, 8>}]} {
    %c0 = arith.constant 0 : index
    %c0_0 = arith.constant 0 : index
    %0 = vector.load %arg3[%c0, %c0_0] : memref<1x4xf32, #tpu.memory_space<vmem>>, vector<1x4xf32>
    %c0_1 = arith.constant 0 : index
    %c0_2 = arith.constant 0 : index
    %1 = vector.load %arg4[%c0_1, %c0_2] : memref<1x4xf32, #tpu.memory_space<vmem>>, vector<1x4xf32>
    %cst = arith.constant 0.000000e+00 : f32
    %2 = vector.broadcast %cst : f32 to vector<4x9x9x4xf32>
    %c0_3 = arith.constant 0 : index
    %c0_4 = arith.constant 0 : index
    %c0_5 = arith.constant 0 : index
    %c0_6 = arith.constant 0 : index
    %3 = vector.load %arg9[%c0_3, %c0_4, %c0_5, %c0_6] : memref<4x9x9x4xf32, #tpu.memory_space<vmem>>, vector<4x9x9x4xf32>
    tpu.vector_store %arg9[%c0_3, %c0_4, %c0_5, %c0_6], %2 {strides = array<i32>} : memref<4x9x9x4xf32, #tpu.memory_space<vmem>>, vector<4x9x9x4xf32>,
    %c0_7 = arith.constant 0 : index
    %c0_8 = arith.constant 0 : index
    %c0_9 = arith.constant 0 : index
    %c0_10 = arith.constant 0 : index
    %c0_11 = arith.constant 0 : index
    %4 = vector.load %arg2[%c0_7, %c0_8, %c0_9, %c0_10, %c0_11] : memref<1x4x8x8x4xf32, #tpu.memory_space<vmem>>, vector<1x1x8x8x4xf32>
    %5 = vector.shape_cast %4 : vector<1x1x8x8x4xf32> to vector<8x8x4xf32>
    %6 = vector.shape_cast %0 : vector<1x4xf32> to vector<1x1x4xf32>
    %7 = vector.broadcast %6 : vector<1x1x4xf32> to vector<8x8x4xf32>
    %8 = arith.mulf %5, %7 : vector<8x8x4xf32>
    %9 = vector.shape_cast %1 : vector<1x4xf32> to vector<1x1x4xf32>
    %10 = vector.broadcast %9 : vector<1x1x4xf32> to vector<8x8x4xf32>
    %11 = arith.addf %8, %10 : vector<8x8x4xf32>
    %cst_12 = arith.constant 0.000000e+00 : f32
    %12 = vector.broadcast %cst_12 : f32 to vector<8x8x4xf32>
    %13 = arith.maximumf %11, %12 : vector<8x8x4xf32>
    %c0_13 = arith.constant 0 : index
    %c1 = arith.constant 1 : index
    %c1_14 = arith.constant 1 : index
    %c0_15 = arith.constant 0 : index
    %14 = vector.load %arg9[%c0_13, %c1, %c1_14, %c0_15] : memref<4x9x9x4xf32, #tpu.memory_space<vmem>>, vector<1x8x8x4xf32>
    %15 = vector.shape_cast %14 : vector<1x8x8x4xf32> to vector<8x8x4xf32>
    %16 = vector.shape_cast %13 : vector<8x8x4xf32> to vector<1x8x8x4xf32>
    tpu.vector_store %arg9[%c0_13, %c1, %c1_14, %c0_15], %16 {strides = array<i32>} : memref<4x9x9x4xf32, #tpu.memory_space<vmem>>, vector<1x8x8x4xf32>,
    %c0_16 = arith.constant 0 : index
    %c1_17 = arith.constant 1 : index
    %c0_18 = arith.constant 0 : index
    %c0_19 = arith.constant 0 : index
    %c0_20 = arith.constant 0 : index
    %17 = vector.load %arg2[%c0_16, %c1_17, %c0_18, %c0_19, %c0_20] : memref<1x4x8x8x4xf32, #tpu.memory_space<vmem>>, vector<1x1x8x8x4xf32>
    %18 = vector.shape_cast %17 : vector<1x1x8x8x4xf32> to vector<8x8x4xf32>
    %19 = vector.shape_cast %0 : vector<1x4xf32> to vector<1x1x4xf32>
    %20 = vector.broadcast %19 : vector<1x1x4xf32> to vector<8x8x4xf32>
    %21 = arith.mulf %18, %20 : vector<8x8x4xf32>
    %22 = vector.shape_cast %1 : vector<1x4xf32> to vector<1x1x4xf32>
    %23 = vector.broadcast %22 : vector<1x1x4xf32> to vector<8x8x4xf32>
    %24 = arith.addf %21, %23 : vector<8x8x4xf32>
    %cst_21 = arith.constant 0.000000e+00 : f32
    %25 = vector.broadcast %cst_21 : f32 to vector<8x8x4xf32>
    %26 = arith.maximumf %24, %25 : vector<8x8x4xf32>
    %c1_22 = arith.constant 1 : index
    %c1_23 = arith.constant 1 : index
    %c0_24 = arith.constant 0 : index
    %c0_25 = arith.constant 0 : index
    %27 = vector.load %arg9[%c1_22, %c1_23, %c0_24, %c0_25] : memref<4x9x9x4xf32, #tpu.memory_space<vmem>>, vector<1x8x8x4xf32>
    %28 = vector.shape_cast %27 : vector<1x8x8x4xf32> to vector<8x8x4xf32>
    %29 = vector.shape_cast %26 : vector<8x8x4xf32> to vector<1x8x8x4xf32>
    tpu.vector_store %arg9[%c1_22, %c1_23, %c0_24, %c0_25], %29 {strides = array<i32>} : memref<4x9x9x4xf32, #tpu.memory_space<vmem>>, vector<1x8x8x4xf32>,
    %c0_26 = arith.constant 0 : index
    %c2 = arith.constant 2 : index
    %c0_27 = arith.constant 0 : index
    %c0_28 = arith.constant 0 : index
    %c0_29 = arith.constant 0 : index
    %30 = vector.load %arg2[%c0_26, %c2, %c0_27, %c0_28, %c0_29] : memref<1x4x8x8x4xf32, #tpu.memory_space<vmem>>, vector<1x1x8x8x4xf32>
    %31 = vector.shape_cast %30 : vector<1x1x8x8x4xf32> to vector<8x8x4xf32>
    %32 = vector.shape_cast %0 : vector<1x4xf32> to vector<1x1x4xf32>
    %33 = vector.broadcast %32 : vector<1x1x4xf32> to vector<8x8x4xf32>
    %34 = arith.mulf %31, %33 : vector<8x8x4xf32>
    %35 = vector.shape_cast %1 : vector<1x4xf32> to vector<1x1x4xf32>
    %36 = vector.broadcast %35 : vector<1x1x4xf32> to vector<8x8x4xf32>
    %37 = arith.addf %34, %36 : vector<8x8x4xf32>
    %cst_30 = arith.constant 0.000000e+00 : f32
    %38 = vector.broadcast %cst_30 : f32 to vector<8x8x4xf32>
    %39 = arith.maximumf %37, %38 : vector<8x8x4xf32>
    %c2_31 = arith.constant 2 : index
    %c0_32 = arith.constant 0 : index
    %c1_33 = arith.constant 1 : index
    %c0_34 = arith.constant 0 : index
    %40 = vector.load %arg9[%c2_31, %c0_32, %c1_33, %c0_34] : memref<4x9x9x4xf32, #tpu.memory_space<vmem>>, vector<1x8x8x4xf32>
    %41 = vector.shape_cast %40 : vector<1x8x8x4xf32> to vector<8x8x4xf32>
    %42 = vector.shape_cast %39 : vector<8x8x4xf32> to vector<1x8x8x4xf32>
    tpu.vector_store %arg9[%c2_31, %c0_32, %c1_33, %c0_34], %42 {strides = array<i32>} : memref<4x9x9x4xf32, #tpu.memory_space<vmem>>, vector<1x8x8x4xf32>,
    %c0_35 = arith.constant 0 : index
    %c3 = arith.constant 3 : index
    %c0_36 = arith.constant 0 : index
    %c0_37 = arith.constant 0 : index
    %c0_38 = arith.constant 0 : index
    %43 = vector.load %arg2[%c0_35, %c3, %c0_36, %c0_37, %c0_38] : memref<1x4x8x8x4xf32, #tpu.memory_space<vmem>>, vector<1x1x8x8x4xf32>
    %44 = vector.shape_cast %43 : vector<1x1x8x8x4xf32> to vector<8x8x4xf32>
    %45 = vector.shape_cast %0 : vector<1x4xf32> to vector<1x1x4xf32>
    %46 = vector.broadcast %45 : vector<1x1x4xf32> to vector<8x8x4xf32>
    %47 = arith.mulf %44, %46 : vector<8x8x4xf32>
    %48 = vector.shape_cast %1 : vector<1x4xf32> to vector<1x1x4xf32>
    %49 = vector.broadcast %48 : vector<1x1x4xf32> to vector<8x8x4xf32>
    %50 = arith.addf %47, %49 : vector<8x8x4xf32>
    %cst_39 = arith.constant 0.000000e+00 : f32
    %51 = vector.broadcast %cst_39 : f32 to vector<8x8x4xf32>
    %52 = arith.maximumf %50, %51 : vector<8x8x4xf32>
    %c3_40 = arith.constant 3 : index
    %c0_41 = arith.constant 0 : index
    %c0_42 = arith.constant 0 : index
    %c0_43 = arith.constant 0 : index
    %53 = vector.load %arg9[%c3_40, %c0_41, %c0_42, %c0_43] : memref<4x9x9x4xf32, #tpu.memory_space<vmem>>, vector<1x8x8x4xf32>
    %54 = vector.shape_cast %53 : vector<1x8x8x4xf32> to vector<8x8x4xf32>
    %55 = vector.shape_cast %52 : vector<8x8x4xf32> to vector<1x8x8x4xf32>
    tpu.vector_store %arg9[%c3_40, %c0_41, %c0_42, %c0_43], %55 {strides = array<i32>} : memref<4x9x9x4xf32, #tpu.memory_space<vmem>>, vector<1x8x8x4xf32>,
    %cst_44 = arith.constant 0.000000e+00 : f32
    %56 = vector.broadcast %cst_44 : f32 to vector<64x8xf32>
    %c0_45 = arith.constant 0 : index
    %c0_46 = arith.constant 0 : index
    %57 = vector.load %arg10[%c0_45, %c0_46] : memref<64x8xf32, #tpu.memory_space<vmem>>, vector<64x8xf32>
    tpu.vector_store %arg10[%c0_45, %c0_46], %56 {strides = array<i32>} : memref<64x8xf32, #tpu.memory_space<vmem>>, vector<64x8xf32>,
    %c0_47 = arith.constant 0 : index
    %c0_48 = arith.constant 0 : index
    %c0_49 = arith.constant 0 : index
    %c0_50 = arith.constant 0 : index
    %58 = vector.load %arg9[%c0_47, %c0_48, %c0_49, %c0_50] : memref<4x9x9x4xf32, #tpu.memory_space<vmem>>, vector<1x8x8x4xf32>
    %59 = vector.shape_cast %58 : vector<1x8x8x4xf32> to vector<8x8x4xf32>
    %60 = vector.shape_cast %59 : vector<8x8x4xf32> to vector<64x4xf32>
    %c0_51 = arith.constant 0 : index
    %c0_52 = arith.constant 0 : index
    %61 = vector.load %arg10[%c0_51, %c0_52] : memref<64x8xf32, #tpu.memory_space<vmem>>, vector<64x8xf32>
    %c0_53 = arith.constant 0 : index
    %c0_54 = arith.constant 0 : index
    %c0_55 = arith.constant 0 : index
    %62 = vector.load %arg5[%c0_53, %c0_54, %c0_55] : memref<9x4x8xf32, #tpu.memory_space<vmem>>, vector<1x4x8xf32>
    %63 = vector.shape_cast %62 : vector<1x4x8xf32> to vector<4x8xf32>
    %cst_56 = arith.constant dense<0.000000e+00> : vector<64x8xf32>
    %64 = tpu.matmul %60, %63, %cst_56 {dimension_numbers = #tpu.dot_dimension_numbers<[1], [0], [0], [1], [0, 0, 1, 1], [], []>} : vector<64x4xf32>, vector<4x8xf32>, vector<64x8xf32> -> vector<64x8xf32>
    %65 = arith.addf %61, %64 : vector<64x8xf32>
    %c0_57 = arith.constant 0 : index
    %c0_58 = arith.constant 0 : index
    %66 = vector.load %arg10[%c0_57, %c0_58] : memref<64x8xf32, #tpu.memory_space<vmem>>, vector<64x8xf32>
    tpu.vector_store %arg10[%c0_57, %c0_58], %65 {strides = array<i32>} : memref<64x8xf32, #tpu.memory_space<vmem>>, vector<64x8xf32>,
    %c1_59 = arith.constant 1 : index
    %c0_60 = arith.constant 0 : index
    %c0_61 = arith.constant 0 : index
    %c0_62 = arith.constant 0 : index
    %67 = vector.load %arg9[%c1_59, %c0_60, %c0_61, %c0_62] : memref<4x9x9x4xf32, #tpu.memory_space<vmem>>, vector<1x8x8x4xf32>
    %68 = vector.shape_cast %67 : vector<1x8x8x4xf32> to vector<8x8x4xf32>
    %69 = vector.shape_cast %68 : vector<8x8x4xf32> to vector<64x4xf32>
    %c0_63 = arith.constant 0 : index
    %c0_64 = arith.constant 0 : index
    %70 = vector.load %arg10[%c0_63, %c0_64] : memref<64x8xf32, #tpu.memory_space<vmem>>, vector<64x8xf32>
    %c1_65 = arith.constant 1 : index
    %c0_66 = arith.constant 0 : index
    %c0_67 = arith.constant 0 : index
    %71 = vector.load %arg5[%c1_65, %c0_66, %c0_67] : memref<9x4x8xf32, #tpu.memory_space<vmem>>, vector<1x4x8xf32>
    %72 = vector.shape_cast %71 : vector<1x4x8xf32> to vector<4x8xf32>
    %cst_68 = arith.constant dense<0.000000e+00> : vector<64x8xf32>
    %73 = tpu.matmul %69, %72, %cst_68 {dimension_numbers = #tpu.dot_dimension_numbers<[1], [0], [0], [1], [0, 0, 1, 1], [], []>} : vector<64x4xf32>, vector<4x8xf32>, vector<64x8xf32> -> vector<64x8xf32>
    %74 = arith.addf %70, %73 : vector<64x8xf32>
    %c0_69 = arith.constant 0 : index
    %c0_70 = arith.constant 0 : index
    %75 = vector.load %arg10[%c0_69, %c0_70] : memref<64x8xf32, #tpu.memory_space<vmem>>, vector<64x8xf32>
    tpu.vector_store %arg10[%c0_69, %c0_70], %74 {strides = array<i32>} : memref<64x8xf32, #tpu.memory_space<vmem>>, vector<64x8xf32>,
    %c0_71 = arith.constant 0 : index
    %c0_72 = arith.constant 0 : index
    %c1_73 = arith.constant 1 : index
    %c0_74 = arith.constant 0 : index
    %76 = vector.load %arg9[%c0_71, %c0_72, %c1_73, %c0_74] : memref<4x9x9x4xf32, #tpu.memory_space<vmem>>, vector<1x8x8x4xf32>
    %77 = vector.shape_cast %76 : vector<1x8x8x4xf32> to vector<8x8x4xf32>
    %78 = vector.shape_cast %77 : vector<8x8x4xf32> to vector<64x4xf32>
    %c0_75 = arith.constant 0 : index
    %c0_76 = arith.constant 0 : index
    %79 = vector.load %arg10[%c0_75, %c0_76] : memref<64x8xf32, #tpu.memory_space<vmem>>, vector<64x8xf32>
    %c2_77 = arith.constant 2 : index
    %c0_78 = arith.constant 0 : index
    %c0_79 = arith.constant 0 : index
    %80 = vector.load %arg5[%c2_77, %c0_78, %c0_79] : memref<9x4x8xf32, #tpu.memory_space<vmem>>, vector<1x4x8xf32>
    %81 = vector.shape_cast %80 : vector<1x4x8xf32> to vector<4x8xf32>
    %cst_80 = arith.constant dense<0.000000e+00> : vector<64x8xf32>
    %82 = tpu.matmul %78, %81, %cst_80 {dimension_numbers = #tpu.dot_dimension_numbers<[1], [0], [0], [1], [0, 0, 1, 1], [], []>} : vector<64x4xf32>, vector<4x8xf32>, vector<64x8xf32> -> vector<64x8xf32>
    %83 = arith.addf %79, %82 : vector<64x8xf32>
    %c0_81 = arith.constant 0 : index
    %c0_82 = arith.constant 0 : index
    %84 = vector.load %arg10[%c0_81, %c0_82] : memref<64x8xf32, #tpu.memory_space<vmem>>, vector<64x8xf32>
    tpu.vector_store %arg10[%c0_81, %c0_82], %83 {strides = array<i32>} : memref<64x8xf32, #tpu.memory_space<vmem>>, vector<64x8xf32>,
    %c2_83 = arith.constant 2 : index
    %c0_84 = arith.constant 0 : index
    %c0_85 = arith.constant 0 : index
    %c0_86 = arith.constant 0 : index
    %85 = vector.load %arg9[%c2_83, %c0_84, %c0_85, %c0_86] : memref<4x9x9x4xf32, #tpu.memory_space<vmem>>, vector<1x8x8x4xf32>
    %86 = vector.shape_cast %85 : vector<1x8x8x4xf32> to vector<8x8x4xf32>
    %87 = vector.shape_cast %86 : vector<8x8x4xf32> to vector<64x4xf32>
    %c0_87 = arith.constant 0 : index
    %c0_88 = arith.constant 0 : index
    %88 = vector.load %arg10[%c0_87, %c0_88] : memref<64x8xf32, #tpu.memory_space<vmem>>, vector<64x8xf32>
    %c3_89 = arith.constant 3 : index
    %c0_90 = arith.constant 0 : index
    %c0_91 = arith.constant 0 : index
    %89 = vector.load %arg5[%c3_89, %c0_90, %c0_91] : memref<9x4x8xf32, #tpu.memory_space<vmem>>, vector<1x4x8xf32>
    %90 = vector.shape_cast %89 : vector<1x4x8xf32> to vector<4x8xf32>
    %cst_92 = arith.constant dense<0.000000e+00> : vector<64x8xf32>
    %91 = tpu.matmul %87, %90, %cst_92 {dimension_numbers = #tpu.dot_dimension_numbers<[1], [0], [0], [1], [0, 0, 1, 1], [], []>} : vector<64x4xf32>, vector<4x8xf32>, vector<64x8xf32> -> vector<64x8xf32>
    %92 = arith.addf %88, %91 : vector<64x8xf32>
    %c0_93 = arith.constant 0 : index
    %c0_94 = arith.constant 0 : index
    %93 = vector.load %arg10[%c0_93, %c0_94] : memref<64x8xf32, #tpu.memory_space<vmem>>, vector<64x8xf32>
    tpu.vector_store %arg10[%c0_93, %c0_94], %92 {strides = array<i32>} : memref<64x8xf32, #tpu.memory_space<vmem>>, vector<64x8xf32>,
    %c3_95 = arith.constant 3 : index
    %c0_96 = arith.constant 0 : index
    %c0_97 = arith.constant 0 : index
    %c0_98 = arith.constant 0 : index
    %94 = vector.load %arg9[%c3_95, %c0_96, %c0_97, %c0_98] : memref<4x9x9x4xf32, #tpu.memory_space<vmem>>, vector<1x8x8x4xf32>
    %95 = vector.shape_cast %94 : vector<1x8x8x4xf32> to vector<8x8x4xf32>
    %96 = vector.shape_cast %95 : vector<8x8x4xf32> to vector<64x4xf32>
    %c0_99 = arith.constant 0 : index
    %c0_100 = arith.constant 0 : index
    %97 = vector.load %arg10[%c0_99, %c0_100] : memref<64x8xf32, #tpu.memory_space<vmem>>, vector<64x8xf32>
    %c4 = arith.constant 4 : index
    %c0_101 = arith.constant 0 : index
    %c0_102 = arith.constant 0 : index
    %98 = vector.load %arg5[%c4, %c0_101, %c0_102] : memref<9x4x8xf32, #tpu.memory_space<vmem>>, vector<1x4x8xf32>
    %99 = vector.shape_cast %98 : vector<1x4x8xf32> to vector<4x8xf32>
    %cst_103 = arith.constant dense<0.000000e+00> : vector<64x8xf32>
    %100 = tpu.matmul %96, %99, %cst_103 {dimension_numbers = #tpu.dot_dimension_numbers<[1], [0], [0], [1], [0, 0, 1, 1], [], []>} : vector<64x4xf32>, vector<4x8xf32>, vector<64x8xf32> -> vector<64x8xf32>
    %101 = arith.addf %97, %100 : vector<64x8xf32>
    %c0_104 = arith.constant 0 : index
    %c0_105 = arith.constant 0 : index
    %102 = vector.load %arg10[%c0_104, %c0_105] : memref<64x8xf32, #tpu.memory_space<vmem>>, vector<64x8xf32>
    tpu.vector_store %arg10[%c0_104, %c0_105], %101 {strides = array<i32>} : memref<64x8xf32, #tpu.memory_space<vmem>>, vector<64x8xf32>,
    %c2_106 = arith.constant 2 : index
    %c0_107 = arith.constant 0 : index
    %c1_108 = arith.constant 1 : index
    %c0_109 = arith.constant 0 : index
    %103 = vector.load %arg9[%c2_106, %c0_107, %c1_108, %c0_109] : memref<4x9x9x4xf32, #tpu.memory_space<vmem>>, vector<1x8x8x4xf32>
    %104 = vector.shape_cast %103 : vector<1x8x8x4xf32> to vector<8x8x4xf32>
    %105 = vector.shape_cast %104 : vector<8x8x4xf32> to vector<64x4xf32>
    %c0_110 = arith.constant 0 : index
    %c0_111 = arith.constant 0 : index
    %106 = vector.load %arg10[%c0_110, %c0_111] : memref<64x8xf32, #tpu.memory_space<vmem>>, vector<64x8xf32>
    %c5 = arith.constant 5 : index
    %c0_112 = arith.constant 0 : index
    %c0_113 = arith.constant 0 : index
    %107 = vector.load %arg5[%c5, %c0_112, %c0_113] : memref<9x4x8xf32, #tpu.memory_space<vmem>>, vector<1x4x8xf32>
    %108 = vector.shape_cast %107 : vector<1x4x8xf32> to vector<4x8xf32>
    %cst_114 = arith.constant dense<0.000000e+00> : vector<64x8xf32>
    %109 = tpu.matmul %105, %108, %cst_114 {dimension_numbers = #tpu.dot_dimension_numbers<[1], [0], [0], [1], [0, 0, 1, 1], [], []>} : vector<64x4xf32>, vector<4x8xf32>, vector<64x8xf32> -> vector<64x8xf32>
    %110 = arith.addf %106, %109 : vector<64x8xf32>
    %c0_115 = arith.constant 0 : index
    %c0_116 = arith.constant 0 : index
    %111 = vector.load %arg10[%c0_115, %c0_116] : memref<64x8xf32, #tpu.memory_space<vmem>>, vector<64x8xf32>
    tpu.vector_store %arg10[%c0_115, %c0_116], %110 {strides = array<i32>} : memref<64x8xf32, #tpu.memory_space<vmem>>, vector<64x8xf32>,
    %c0_117 = arith.constant 0 : index
    %c1_118 = arith.constant 1 : index
    %c0_119 = arith.constant 0 : index
    %c0_120 = arith.constant 0 : index
    %112 = vector.load %arg9[%c0_117, %c1_118, %c0_119, %c0_120] : memref<4x9x9x4xf32, #tpu.memory_space<vmem>>, vector<1x8x8x4xf32>
    %113 = vector.shape_cast %112 : vector<1x8x8x4xf32> to vector<8x8x4xf32>
    %114 = vector.shape_cast %113 : vector<8x8x4xf32> to vector<64x4xf32>
    %c0_121 = arith.constant 0 : index
    %c0_122 = arith.constant 0 : index
    %115 = vector.load %arg10[%c0_121, %c0_122] : memref<64x8xf32, #tpu.memory_space<vmem>>, vector<64x8xf32>
    %c6 = arith.constant 6 : index
    %c0_123 = arith.constant 0 : index
    %c0_124 = arith.constant 0 : index
    %116 = vector.load %arg5[%c6, %c0_123, %c0_124] : memref<9x4x8xf32, #tpu.memory_space<vmem>>, vector<1x4x8xf32>
    %117 = vector.shape_cast %116 : vector<1x4x8xf32> to vector<4x8xf32>
    %cst_125 = arith.constant dense<0.000000e+00> : vector<64x8xf32>
    %118 = tpu.matmul %114, %117, %cst_125 {dimension_numbers = #tpu.dot_dimension_numbers<[1], [0], [0], [1], [0, 0, 1, 1], [], []>} : vector<64x4xf32>, vector<4x8xf32>, vector<64x8xf32> -> vector<64x8xf32>
    %119 = arith.addf %115, %118 : vector<64x8xf32>
    %c0_126 = arith.constant 0 : index
    %c0_127 = arith.constant 0 : index
    %120 = vector.load %arg10[%c0_126, %c0_127] : memref<64x8xf32, #tpu.memory_space<vmem>>, vector<64x8xf32>
    tpu.vector_store %arg10[%c0_126, %c0_127], %119 {strides = array<i32>} : memref<64x8xf32, #tpu.memory_space<vmem>>, vector<64x8xf32>,
    %c1_128 = arith.constant 1 : index
    %c1_129 = arith.constant 1 : index
    %c0_130 = arith.constant 0 : index
    %c0_131 = arith.constant 0 : index
    %121 = vector.load %arg9[%c1_128, %c1_129, %c0_130, %c0_131] : memref<4x9x9x4xf32, #tpu.memory_space<vmem>>, vector<1x8x8x4xf32>
    %122 = vector.shape_cast %121 : vector<1x8x8x4xf32> to vector<8x8x4xf32>
    %123 = vector.shape_cast %122 : vector<8x8x4xf32> to vector<64x4xf32>
    %c0_132 = arith.constant 0 : index
    %c0_133 = arith.constant 0 : index
    %124 = vector.load %arg10[%c0_132, %c0_133] : memref<64x8xf32, #tpu.memory_space<vmem>>, vector<64x8xf32>
    %c7 = arith.constant 7 : index
    %c0_134 = arith.constant 0 : index
    %c0_135 = arith.constant 0 : index
    %125 = vector.load %arg5[%c7, %c0_134, %c0_135] : memref<9x4x8xf32, #tpu.memory_space<vmem>>, vector<1x4x8xf32>
    %126 = vector.shape_cast %125 : vector<1x4x8xf32> to vector<4x8xf32>
    %cst_136 = arith.constant dense<0.000000e+00> : vector<64x8xf32>
    %127 = tpu.matmul %123, %126, %cst_136 {dimension_numbers = #tpu.dot_dimension_numbers<[1], [0], [0], [1], [0, 0, 1, 1], [], []>} : vector<64x4xf32>, vector<4x8xf32>, vector<64x8xf32> -> vector<64x8xf32>
    %128 = arith.addf %124, %127 : vector<64x8xf32>
    %c0_137 = arith.constant 0 : index
    %c0_138 = arith.constant 0 : index
    %129 = vector.load %arg10[%c0_137, %c0_138] : memref<64x8xf32, #tpu.memory_space<vmem>>, vector<64x8xf32>
    tpu.vector_store %arg10[%c0_137, %c0_138], %128 {strides = array<i32>} : memref<64x8xf32, #tpu.memory_space<vmem>>, vector<64x8xf32>,
    %c0_139 = arith.constant 0 : index
    %c1_140 = arith.constant 1 : index
    %c1_141 = arith.constant 1 : index
    %c0_142 = arith.constant 0 : index
    %130 = vector.load %arg9[%c0_139, %c1_140, %c1_141, %c0_142] : memref<4x9x9x4xf32, #tpu.memory_space<vmem>>, vector<1x8x8x4xf32>
    %131 = vector.shape_cast %130 : vector<1x8x8x4xf32> to vector<8x8x4xf32>
    %132 = vector.shape_cast %131 : vector<8x8x4xf32> to vector<64x4xf32>
    %c0_143 = arith.constant 0 : index
    %c0_144 = arith.constant 0 : index
    %133 = vector.load %arg10[%c0_143, %c0_144] : memref<64x8xf32, #tpu.memory_space<vmem>>, vector<64x8xf32>
    %c8 = arith.constant 8 : index
    %c0_145 = arith.constant 0 : index
    %c0_146 = arith.constant 0 : index
    %134 = vector.load %arg5[%c8, %c0_145, %c0_146] : memref<9x4x8xf32, #tpu.memory_space<vmem>>, vector<1x4x8xf32>
    %135 = vector.shape_cast %134 : vector<1x4x8xf32> to vector<4x8xf32>
    %cst_147 = arith.constant dense<0.000000e+00> : vector<64x8xf32>
    %136 = tpu.matmul %132, %135, %cst_147 {dimension_numbers = #tpu.dot_dimension_numbers<[1], [0], [0], [1], [0, 0, 1, 1], [], []>} : vector<64x4xf32>, vector<4x8xf32>, vector<64x8xf32> -> vector<64x8xf32>
    %137 = arith.addf %133, %136 : vector<64x8xf32>
    %c0_148 = arith.constant 0 : index
    %c0_149 = arith.constant 0 : index
    %138 = vector.load %arg10[%c0_148, %c0_149] : memref<64x8xf32, #tpu.memory_space<vmem>>, vector<64x8xf32>
    tpu.vector_store %arg10[%c0_148, %c0_149], %137 {strides = array<i32>} : memref<64x8xf32, #tpu.memory_space<vmem>>, vector<64x8xf32>,
    %c0_150 = arith.constant 0 : index
    %c0_151 = arith.constant 0 : index
    %139 = vector.load %arg10[%c0_150, %c0_151] : memref<64x8xf32, #tpu.memory_space<vmem>>, vector<64x8xf32>
    %140 = vector.shape_cast %139 : vector<64x8xf32> to vector<8x8x8xf32>
    %c0_152 = arith.constant 0 : index
    %c0_153 = arith.constant 0 : index
    %c0_154 = arith.constant 0 : index
    %c0_155 = arith.constant 0 : index
    %141 = vector.load %arg7[%c0_152, %c0_153, %c0_154, %c0_155] : memref<1x8x8x8xf32, #tpu.memory_space<vmem>>, vector<1x8x8x8xf32>
    %142 = vector.shape_cast %141 : vector<1x8x8x8xf32> to vector<8x8x8xf32>
    %143 = vector.shape_cast %140 : vector<8x8x8xf32> to vector<1x8x8x8xf32>
    tpu.vector_store %arg7[%c0_152, %c0_153, %c0_154, %c0_155], %143 {strides = array<i32>} : memref<1x8x8x8xf32, #tpu.memory_space<vmem>>, vector<1x8x8x8xf32>,
    %144 = vector.shape_cast %52 : vector<8x8x4xf32> to vector<64x4xf32>
    %c0_156 = arith.constant 0 : index
    %c0_157 = arith.constant 0 : index
    %145 = vector.load %arg6[%c0_156, %c0_157] : memref<4x8xf32, #tpu.memory_space<vmem>>, vector<4x8xf32>
    %cst_158 = arith.constant dense<0.000000e+00> : vector<64x8xf32>
    %146 = tpu.matmul %144, %145, %cst_158 {dimension_numbers = #tpu.dot_dimension_numbers<[1], [0], [0], [1], [0, 0, 1, 1], [], []>} : vector<64x4xf32>, vector<4x8xf32>, vector<64x8xf32> -> vector<64x8xf32>
    %147 = vector.shape_cast %146 : vector<64x8xf32> to vector<8x8x8xf32>
    %c0_159 = arith.constant 0 : index
    %c0_160 = arith.constant 0 : index
    %c0_161 = arith.constant 0 : index
    %c0_162 = arith.constant 0 : index
    %148 = vector.load %arg8[%c0_159, %c0_160, %c0_161, %c0_162] : memref<1x8x8x8xf32, #tpu.memory_space<vmem>>, vector<1x8x8x8xf32>
    %149 = vector.shape_cast %148 : vector<1x8x8x8xf32> to vector<8x8x8xf32>
    %150 = vector.shape_cast %147 : vector<8x8x8xf32> to vector<1x8x8x8xf32>
    tpu.vector_store %arg8[%c0_159, %c0_160, %c0_161, %c0_162], %150 {strides = array<i32>} : memref<1x8x8x8xf32, #tpu.memory_space<vmem>>, vector<1x8x8x8xf32>,
    return
  }
  func.func @transform_0(%arg0: i32, %arg1: i32) -> (i32, i32, i32, i32, i32) {
    %c0_i32 = arith.constant 0 : i32
    %c0_i32_0 = arith.constant 0 : i32
    %c0_i32_1 = arith.constant 0 : i32
    %c0_i32_2 = arith.constant 0 : i32
    %c0_i32_3 = arith.constant 0 : i32
    return %arg0, %c0_i32, %c0_i32_0, %c0_i32_1, %c0_i32_2 : i32, i32, i32, i32, i32
  }
  func.func @transform_1(%arg0: i32, %arg1: i32) -> (i32, i32) {
    %c0_i32 = arith.constant 0 : i32
    %c0_i32_0 = arith.constant 0 : i32
    %c0_i32_1 = arith.constant 0 : i32
    return %c0_i32, %c0_i32_0 : i32, i32
  }
  func.func @transform_2(%arg0: i32, %arg1: i32) -> (i32, i32) {
    %c0_i32 = arith.constant 0 : i32
    %c0_i32_0 = arith.constant 0 : i32
    %c0_i32_1 = arith.constant 0 : i32
    return %c0_i32, %c0_i32_0 : i32, i32
  }
  func.func @transform_3(%arg0: i32, %arg1: i32) -> (i32, i32, i32) {
    %c0_i32 = arith.constant 0 : i32
    %c0_i32_0 = arith.constant 0 : i32
    %c0_i32_1 = arith.constant 0 : i32
    return %c0_i32, %c0_i32_0, %arg1 : i32, i32, i32
  }
  func.func @transform_4(%arg0: i32, %arg1: i32) -> (i32, i32) {
    %c0_i32 = arith.constant 0 : i32
    %c0_i32_0 = arith.constant 0 : i32
    return %c0_i32, %arg1 : i32, i32
  }
  func.func @transform_5(%arg0: i32, %arg1: i32) -> (i32, i32, i32, i32) {
    %c0_i32 = arith.constant 0 : i32
    %c0_i32_0 = arith.constant 0 : i32
    %c0_i32_1 = arith.constant 0 : i32
    return %arg0, %c0_i32, %c0_i32_0, %arg1 : i32, i32, i32, i32
  }
  func.func @transform_6(%arg0: i32, %arg1: i32) -> (i32, i32, i32, i32) {
    %c0_i32 = arith.constant 0 : i32
    %c0_i32_0 = arith.constant 0 : i32
    %c0_i32_1 = arith.constant 0 : i32
    return %arg0, %c0_i32, %c0_i32_0, %arg1 : i32, i32, i32, i32
  }
}

</mosaic_0001>

<bundles_post_ra>
// kernel: tpu_custom_call.1
= control target key start
LH: loop header
LB: loop body
LE: loop exit
PB: predicated region body
PF: predicated region fallthrough
CT: control target
= control target key end

     0   :  { %12 = vsyncpa [#allocation5], 0  ;;  %s3824_s0 = inlined_call_operand.vmem [shape: f32[2,4,8,8,4], index: 0, kind: input, shape index: {}]   ;;  %s3825_s1 = inlined_call_operand.vmem [shape: f32[1,4], index: 1, kind: input, shape index: {}]   ;;  %s3826_s2 = inlined_call_operand.vmem [shape: f32[1,4], index: 2, kind: input, shape index: {}]   ;;  %s3827_s3 = inlined_call_operand.vmem [shape: f32[9,4,8], index: 3, kind: input, shape index: {}]   ;;  %s3828_s4 = inlined_call_operand.vmem [shape: f32[4,8], index: 4, kind: input, shape index: {}]   ;;  %s3829_s5 = inlined_call_operand.hbm [shape: f32[2,8,8,8], index: 5, kind: output, shape index: {0}]   ;;  %s3830_s6 = inlined_call_operand.hbm [shape: f32[2,8,8,8], index: 6, kind: output, shape index: {1}]  }
   0x1   :  { %14 = vsyncpa [#allocation5 + $0x1], 0 }
   0x2   :  { %15 = vsyncpa [#allocation7], 0 }
   0x3   :  { %17 = vsyncpa [#allocation7 + $0x1], 0  ;;  %s2987_s21 = smov 0   ;;  %s2989_s22 = smov 0  }
   0x4   :  { %s2991_s23 = smov 0   ;;  %s2993_s24 = smov 0  }
   0x5   :  { %s2995_s25 = smov 0   ;;  %s2997_s26 = smov 0  }
   0x6 LB: > { %s2400_s27 = sadd.s32 4294967295, %s2945_s26   ;;  %s2401_s28 = sadd.s32 4294967294, %s2945_s26   ;;  %s2945_s26 = sphi %s2997_s26, %s23_s26   ;;  %s2941_s25 = sphi %s2995_s25, %s3839_s25   ;;  %s2937_s24 = sphi %s2993_s24, %s3838_s24   ;;  %s2933_s23 = sphi %s2991_s23, %s3837_s23   ;;  %s2929_s22 = sphi %s2989_s22, %s3836_s22   ;;  %s2925_s21 = sphi %s2987_s21, %s3835_s21  }
   0x7   : > { %s35_s29 = sadd.s32 1, %s2941_s25  ;;  %s164_s30 = sadd.s32 1, %s2933_s23 }
   0x8   : > { %p37_p0 = scmp.ge.s32.totalorder %s35_s29, 2  ;;  %p174_p1 = scmp.ne.s32.totalorder %s2933_s23, %s2929_s22 }
   0x9   : > { %p175_p2 = scmp.eq.s32.totalorder %s2400_s27, 1  ;;  %p180_p3 = scmp.ne.s32.totalorder %s2929_s22, %s2925_s21 }
   0xa   : > { %s3841_s29 = smov (%p37_p0, %s35_s29), 0  ;;  %p181_p5 = scmp.eq.s32.totalorder %s2401_s28, 1 }
   0xb   : > { %p3027_p4 = por %p175_p2, %p174_p1  ;;  %s159_s8 = ssub.s32 %s2941_s25, %s3841_s29 }
   0xc   : > { %p2406_p6 = scmp.ge.s32.totalorder %s2945_s26, 1  ;;  %p162_p7 = scmp.eq.s32.totalorder %s159_s8, 0 }
   0xd   : > { %p3034_p8 = por %p181_p5, %p180_p3  ;;  %p255_p9 = scmp.lt.s32.totalorder %s2945_s26, 3 }
   0xe   : > { %s3040_s10 = scalar_select %p162_p7, %s2933_s23, %s164_s30  }
   0xf   : > { %p256_p10 = pnand %p2406_p6, %p255_p9 }
  0x10   : > { %p298_p11 = scmp.lt.s32.totalorder (!%p256_p10), %s2937_s24, 1  ;;  %s3650_s12 = sand.u32 (!%p256_p10), 1, %s2929_s22  }
  0x11   : > { %259 = sbr.rel (%p256_p10) target bundleno = 381 (0x17d), region = 40  ;;  %s2407_s14 = sshll.u32 (!%p256_p10), %s3650_s12, 6 }
  0x12   : > { %s3831_s15 = sshll.u32 (!%p256_p10), %s2937_s24, 10  ;;  %s2948_s28 = smov (!%p256_p10), [#allocation6]  }
  0x13   : > { %s3710_s19 = scalar_lea.hbm (!%p256_p10), %s3830_s6, %s3831_s15  ;;  %s2843_s30 = sshll.u32 (!%p256_p10), %s2948_s28, 4  ;;  %s2844_s30 = int_to_ptr.vmem [resolvable:$false] %s2843_s30 }
  0x14   : > { %s2845_s8 = scalar_lea.vmem (!%p256_p10), %s2844_s30, 2048 }
  0x16   : > { %v591_v0 = vld [vmem:[%s3827_s3] sm:$0xf]  ;;  %vm616_vm0 = vcmask 1043456   ;;  %vm313_vm1 = vcmask 31744   ;;  %v2947_v1 = vmov 0.0   ;;  %vm315_vm2 = vcmask 24576  }
  0x17   : > { %2636 = vmatprep.subr.msk.mxu0 %vm616_vm0, %v591_v0  ;;  %314 = vst.msk [vmem:[#allocation2] sm:$0xff] %vm313_vm1, %v2947_v1  ;;  %317 = vst.msk [vmem:[#allocation2 + $0x10] sm:$0xff] %vm313_vm1, %v2947_v1  ;;  %vm566_vm3 = vcmask 64512   ;;  %s3119_s13 = scalar_select %p298_p11, %s2937_s24, 1  ;;  %v3158_v2 = vld [vmem:[%s3827_s3 + $0x8] sm:$0xf] }
  0x18   : > { %319 = vst.msk [vmem:[#allocation2 + $0x20] sm:$0xff] %vm313_vm1, %v2947_v1  ;;  %321 = vst.msk [vmem:[#allocation2 + $0x30] sm:$0xff] %vm313_vm1, %v2947_v1  ;;  %2637 = vmatpush3.msk.msra.mxu0 %vm616_vm0, %v591_v0  ;;  %v2446_v3 = vld [vmem:[%s3827_s3 + $0x4] sm:$0xf]  ;;  %v3185_v4 = vld [vmem:[%s3827_s3 + $0xc] sm:$0xf] }
  0x19   : > { %323 = vst.msk [vmem:[#allocation2 + $0x40] sm:$0xff] %vm313_vm1, %v2947_v1  ;;  %325 = vst.msk [vmem:[#allocation2 + $0x50] sm:$0xff] %vm313_vm1, %v2947_v1  ;;  %2664 = vmatprep.subr.msk.mxu0 %vm616_vm0, %v3158_v2  ;;  %2650 = vmatprep.subr.msk.mxu1 %vm616_vm0, %v2446_v3  ;;  %s2543_s20 = sshll.u32 %s3119_s13, 8  ;;  %v3191_v5 = vld [vmem:[%s3825_s1] ss:$0 sm:$0xff]  ;;  %s3669_s13 = scalar_lea.vmem [#allocation6], %s2407_s14 }
  0x1a   : > { %327 = vst.msk [vmem:[#allocation2 + $0x60] sm:$0xff] %vm313_vm1, %v2947_v1  ;;  %329 = vst.msk [vmem:[#allocation2 + $0x70] sm:$0xff] %vm313_vm1, %v2947_v1  ;;  %2651 = vmatpush3.msk.msra.mxu1 %vm616_vm0, %v2446_v3  ;;  %s3197_s11 = scalar_lea.vmem %s3824_s0, %s2543_s20  ;;  %v3202_v6 = vld [vmem:[%s3826_s2] ss:$0 sm:$0xff]  ;;  %s2264_s16 = sshll.u32 %s3669_s13, 4  ;;  %s3712_s16 = int_to_ptr.vmem [resolvable:$true] %s2264_s16 }
  0x1b   : > { %331 = vst.msk [vmem:[#allocation2 + $0x80] sm:$0xff] %vm313_vm1, %v2947_v1  ;;  %333 = vst.msk [vmem:[#allocation2 + $0x90] sm:$0xff] %vm313_vm1, %v2947_v1  ;;  %2678 = vmatprep.subr.msk.mxu1 %vm616_vm0, %v3185_v4  ;;  %v387_v7 = vld [vmem:[%s3197_s11] sm:$0xff]  ;;  %v388_v8 = vld [vmem:[%s3197_s11 + $0x8] sm:$0xff]  ;;  %s2233_s20 = scalar_lea.sflag [#allocation7], %s3650_s12  ;;  %s2839_s27 = scalar_lea.vmem %s3712_s16, 1024 }
  0x1c   : > { %335 = vst.msk [vmem:[#allocation2 + $0xa0] sm:$0xff] %vm313_vm1, %v2947_v1  ;;  %337 = vst.msk [vmem:[#allocation2 + $0xb0] sm:$0xff] %vm313_vm1, %v2947_v1  ;;  %v389_v9 = vld [vmem:[%s3197_s11 + $0x10] sm:$0xff]  ;;  %v401_v10 = vmul.f32 %v3191_v5, %v387_v7  ;;  %v402_v11 = vmul.f32 %v3191_v5, %v388_v8  ;;  %v390_v13 = vld [vmem:[%s3197_s11 + $0x18] sm:$0xff]  ;;  %p2840_p12 = scmp.ne.s32.totalorder %s3712_s16, %s2839_s27  ;;  %p2846_p1 = scmp.lt.s32.totalorder %s3712_s16, %s2844_s30 }
  0x1d   : > { %339 = vst.msk [vmem:[#allocation2 + $0xc0] sm:$0xff] %vm313_vm1, %v2947_v1  ;;  %341 = vst.msk [vmem:[#allocation2 + $0xd0] sm:$0xff] %vm313_vm1, %v2947_v1  ;;  %v403_v12 = vmul.f32 %v3191_v5, %v389_v9  ;;  %v391_v14 = vld [vmem:[%s3197_s11 + $0x20] sm:$0xff]  ;;  %v404_v17 = vmul.f32 %v3191_v5, %v390_v13  ;;  %v392_v21 = vld [vmem:[%s3197_s11 + $0x28] sm:$0xff]  ;;  %p2847_p2 = scmp.lt.s32.totalorder %s2845_s8, %s2839_s27 }
  0x1e   : > { %343 = vst.msk [vmem:[#allocation2 + $0xe0] sm:$0xff] %vm313_vm1, %v2947_v1  ;;  %345 = vst.msk [vmem:[#allocation2 + $0xf0] sm:$0xff] %vm313_vm1, %v2947_v1  ;;  %v2413_v15 = vld [vmem:[%s3197_s11 + $0x40] sm:$0xff]  ;;  %v405_v19 = vmul.f32 %v3191_v5, %v391_v14  ;;  %v415_v22 = vadd.f32 %v3202_v6, %v401_v10  ;;  %v416_v23 = vadd.f32 %v3202_v6, %v402_v11  ;;  %v2414_v25 = vld [vmem:[%s3197_s11 + $0x48] sm:$0xff]  ;;  %p2841_p13 = pnand %p2840_p12, %p3027_p4 }
  0x1f   : > { %347 = vst.msk [vmem:[#allocation2 + $0x100] sm:$0xff] %vm313_vm1, %v2947_v1  ;;  %349 = vst.msk [vmem:[#allocation2 + $0x110] sm:$0xff] %vm313_vm1, %v2947_v1  ;;  %v575_v16 = vld [vmem:[#allocation2] sm:$0xff]  ;;  %v449_v20 = vmul.f32 %v2413_v15, %v3191_v5  ;;  %v417_v24 = vadd.f32 %v3202_v6, %v403_v12  ;;  %v418_v26 = vadd.f32 %v3202_v6, %v404_v17  ;;  %v393_v30 = vld [vmem:[%s3197_s11 + $0x30] sm:$0xff]  ;;  %p2848_p3 = por %p2847_p2, %p2846_p1 }
  0x20   : > { %351 = vst.msk [vmem:[#allocation2 + $0x120] sm:$0xff] %vm313_vm1, %v2947_v1  ;;  %353 = vst.msk [vmem:[#allocation2 + $0x130] sm:$0xff] %vm313_vm1, %v2947_v1  ;;  %2638 = vmatprep.mubr.msk.f32.mxu0 %vm313_vm1, %v575_v16  ;;  %v419_v27 = vadd.f32 %v3202_v6, %v405_v19  ;;  %v406_v29 = vmul.f32 %v3191_v5, %v392_v21  ;;  %v2415_v31 = vld [vmem:[%s3197_s11 + $0x50] sm:$0xff]  ;;  %v2416_v32 = vld [vmem:[%s3197_s11 + $0x58] sm:$0xff]  ;;  %v423_v33 = vmax.f32 %v415_v22, 0.0  ;;  %v424_v34 = vmax.f32 %v416_v23, 0.0  ;;  %p2842_p0 = pneg %p2841_p13 }
  0x21   : > { %355 = vst.msk [vmem:[#allocation2 + $0x140] sm:$0xff] %vm313_vm1, %v2947_v1  ;;  %357 = vst.msk [vmem:[#allocation2 + $0x150] sm:$0xff] %vm313_vm1, %v2947_v1  ;;  %v457_v28 = vadd.f32 %v3202_v6, %v449_v20  ;;  %v425_v35 = vmax.f32 %v417_v24, 0.0  ;;  %v450_v36 = vmul.f32 %v2414_v25, %v3191_v5  ;;  %v2417_v37 = vld [vmem:[%s3197_s11 + $0x60] sm:$0xff]  ;;  %v2418_v38 = vld [vmem:[%s3197_s11 + $0x68] sm:$0xff]  ;;  %v426_v40 = vmax.f32 %v418_v26, 0.0 }
  0x22   : > { %359 = vst.msk [vmem:[#allocation2 + $0x160] sm:$0xff] %vm313_vm1, %v2947_v1  ;;  %361 = vst.msk [vmem:[#allocation2 + $0x170] sm:$0xff] %vm313_vm1, %v2947_v1  ;;  %v742_v18 = vld [vmem:[#allocation2 + $0x90] sm:$0xff]  ;;  %v427_v41 = vmax.f32 %v419_v27, 0.0  ;;  %v420_v43 = vadd.f32 %v3202_v6, %v406_v29  ;;  %v407_v45 = vmul.f32 %v3191_v5, %v393_v30  ;;  %v451_v46 = vmul.f32 %v2415_v31, %v3191_v5  ;;  %v2421_v48 = vld [vmem:[%s3197_s11 + $0x80] sm:$0xff]  ;;  %p2849_p5 = pnand %p2848_p3, %p2842_p0 }
  0x23   : > { %363 = vst.msk [vmem:[#allocation2 + $0x180] sm:$0xff] %vm313_vm1, %v2947_v1  ;;  %365 = vst.msk [vmem:[#allocation2 + $0x190] sm:$0xff] %vm313_vm1, %v2947_v1  ;;  %2652 = vmatprep.mubr.msk.f32.mxu1 %vm313_vm1, %v742_v18  ;;  %v2419_v39 = vld [vmem:[%s3197_s11 + $0x70] sm:$0xff]  ;;  %v465_v42 = vmax.f32 %v457_v28, 0.0  ;;  %v458_v44 = vadd.f32 %v3202_v6, %v450_v36  ;;  %v452_v47 = vmul.f32 %v2416_v32, %v3191_v5  ;;  %v2422_v53 = vld [vmem:[%s3197_s11 + $0x88] sm:$0xff] }
  0x24   : > { %369 = vst.msk [vmem:[#allocation2 + $0x1b0] sm:$0xff] %vm313_vm1, %v2947_v1  ;;  %371 = vst.msk [vmem:[#allocation2 + $0x1c0] sm:$0xff] %vm313_vm1, %v2947_v1  ;;  %v428_v49 = vmax.f32 %v420_v43, 0.0  ;;  %v453_v50 = vmul.f32 %v2417_v37, %v3191_v5  ;;  %v454_v51 = vmul.f32 %v2418_v38, %v3191_v5  ;;  %v455_v52 = vmul.f32 %v2419_v39, %v3191_v5  ;;  %v2423_v62 = vld [vmem:[%s3197_s11 + $0x90] sm:$0xff]  ;;  %v2424_v63 = vld [vmem:[%s3197_s11 + $0x98] sm:$0xff] }
  0x25   : > { %373 = vst.msk [vmem:[#allocation2 + $0x1d0] sm:$0xff] %vm313_vm1, %v2947_v1  ;;  %375 = vst.msk [vmem:[#allocation2 + $0x1e0] sm:$0xff] %vm313_vm1, %v2947_v1  ;;  %v466_v54 = vmax.f32 %v458_v44, 0.0  ;;  %v421_v55 = vadd.f32 %v3202_v6, %v407_v45  ;;  %v459_v56 = vadd.f32 %v3202_v6, %v451_v46  ;;  %v460_v57 = vadd.f32 %v3202_v6, %v452_v47  ;;  %v2425_v0 = vld [vmem:[%s3197_s11 + $0xa0] sm:$0xff]  ;;  %v2426_v9 = vld [vmem:[%s3197_s11 + $0xa8] sm:$0xff] }
  0x26   : > { %377 = vst.msk [vmem:[#allocation2 + $0x1f0] sm:$0xff] %vm313_vm1, %v2947_v1  ;;  %379 = vst.msk [vmem:[#allocation2 + $0x200] sm:$0xff] %vm313_vm1, %v2947_v1  ;;  %v461_v58 = vadd.f32 %v3202_v6, %v453_v50  ;;  %v462_v59 = vadd.f32 %v3202_v6, %v454_v51  ;;  %v463_v60 = vadd.f32 %v3202_v6, %v455_v52  ;;  %v2429_v10 = vld [vmem:[%s3197_s11 + $0xc0] sm:$0xff]  ;;  %v2430_v11 = vld [vmem:[%s3197_s11 + $0xc8] sm:$0xff] }
  0x27   : > { %381 = vst.msk [vmem:[#allocation2 + $0x210] sm:$0xff] %vm313_vm1, %v2947_v1  ;;  %383 = vst.msk [vmem:[#allocation2 + $0x220] sm:$0xff] %vm313_vm1, %v2947_v1  ;;  %v491_v61 = vmul.f32 %v2421_v48, %v3191_v5  ;;  %v467_v3 = vmax.f32 %v459_v56, 0.0  ;;  %v468_v7 = vmax.f32 %v460_v57, 0.0  ;;  %v492_v8 = vmul.f32 %v2422_v53, %v3191_v5  ;;  %v3275_v16 = vld [vmem:[%s3827_s3 + $0x10] sm:$0xf] }
  0x28   : > { %318 = vst.msk [vmem:[#allocation2 + $0x18] sm:$0x1] %vm315_vm2, %v2947_v1  ;;  %316 = vst.msk [vmem:[#allocation2 + $0x8] sm:$0x1] %vm315_vm2, %v2947_v1  ;;  %v469_v12 = vmax.f32 %v461_v58, 0.0  ;;  %v470_v13 = vmax.f32 %v462_v59, 0.0  ;;  %v493_v18 = vmul.f32 %v2423_v62, %v3191_v5  ;;  %v494_v19 = vmul.f32 %v2424_v63, %v3191_v5 }
  0x29   : > { %320 = vst.msk [vmem:[#allocation2 + $0x28] sm:$0x1] %vm315_vm2, %v2947_v1  ;;  %322 = vst.msk [vmem:[#allocation2 + $0x38] sm:$0x1] %vm315_vm2, %v2947_v1  ;;  %v471_v14 = vmax.f32 %v463_v60, 0.0  ;;  %v499_v15 = vadd.f32 %v3202_v6, %v491_v61  ;;  %v500_v17 = vadd.f32 %v3202_v6, %v492_v8  ;;  %v495_v20 = vmul.f32 %v2425_v0, %v3191_v5  ;;  %v2427_v27 = vld [vmem:[%s3197_s11 + $0xb0] sm:$0xff] }
  0x2a   : > { %324 = vst.msk [vmem:[#allocation2 + $0x48] sm:$0x1] %vm315_vm2, %v2947_v1  ;;  %326 = vst.msk [vmem:[#allocation2 + $0x58] sm:$0x1] %vm315_vm2, %v2947_v1  ;;  %v496_v24 = vmul.f32 %v2426_v9, %v3191_v5  ;;  %v533_v25 = vmul.f32 %v2429_v10, %v3191_v5  ;;  %v534_v26 = vmul.f32 %v2430_v11, %v3191_v5  ;;  %v3301_v32 = vld [vmem:[%s3827_s3 + $0x14] sm:$0xf] }
  0x2b   : > { %328 = vst.msk [vmem:[#allocation2 + $0x68] sm:$0x1] %vm315_vm2, %v2947_v1  ;;  %330 = vst.msk [vmem:[#allocation2 + $0x78] sm:$0x1] %vm315_vm2, %v2947_v1  ;;  %v507_v23 = vmax.f32 %v499_v15, 0.0  ;;  %v508_v29 = vmax.f32 %v500_v17, 0.0  ;;  %v501_v30 = vadd.f32 %v3202_v6, %v493_v18  ;;  %v502_v31 = vadd.f32 %v3202_v6, %v494_v19 }
  0x2c   : > { %332 = vst.msk [vmem:[#allocation2 + $0x88] sm:$0x1] %vm315_vm2, %v2947_v1  ;;  %352 = vst.msk [vmem:[#allocation2 + $0x128] sm:$0x1] %vm315_vm2, %v2947_v1  ;;  %v504_v36 = vadd.f32 %v3202_v6, %v496_v24  ;;  %v3314_v37 = vadd.f32 %v3202_v6, %v533_v25  ;;  %v3317_v38 = vadd.f32 %v3202_v6, %v534_v26  ;;  %v2431_v39 = vld [vmem:[%s3197_s11 + $0xd0] sm:$0xff]  ;;  %v2433_v45 = vld [vmem:[%s3197_s11 + $0xe0] sm:$0xff] }
  0x2d   : > { %354 = vst.msk [vmem:[#allocation2 + $0x138] sm:$0x1] %vm315_vm2, %v2947_v1  ;;  %356 = vst.msk [vmem:[#allocation2 + $0x148] sm:$0x1] %vm315_vm2, %v2947_v1  ;;  %v497_v44 = vmul.f32 %v2427_v27, %v3191_v5  ;;  %v2434_v46 = vld [vmem:[%s3197_s11 + $0xe8] sm:$0xff]  ;;  %v2435_v52 = vld [vmem:[%s3197_s11 + $0xf0] sm:$0xff]  ;;  %v535_v53 = vmul.f32 %v2431_v39, %v3191_v5  ;;  %v537_v61 = vmul.f32 %v2433_v45, %v3191_v5 }
  0x2e   : > { %358 = vst.msk [vmem:[#allocation2 + $0x158] sm:$0x1] %vm315_vm2, %v2947_v1  ;;  %360 = vst.msk [vmem:[#allocation2 + $0x168] sm:$0x1] %vm315_vm2, %v2947_v1  ;;  %v512_v48 = vmax.f32 %v504_v36, 0.0  ;;  %v550_v50 = vmax.f32 %v3317_v38, 0.0  ;;  %v538_v62 = vmul.f32 %v2434_v46, %v3191_v5 }
  0x2f   : > { %362 = vst.msk [vmem:[#allocation2 + $0x178] sm:$0x1] %vm315_vm2, %v2947_v1  ;;  %364 = vst.msk [vmem:[#allocation2 + $0x188] sm:$0x1] %vm315_vm2, %v2947_v1  ;;  %v394_v56 = vld [vmem:[%s3197_s11 + $0x38] sm:$0xff]  ;;  %v3388_v11 = vadd.f32 %v3202_v6, %v537_v61  ;;  %v908_v27 = vld [vmem:[#allocation2 + $0x1] sm:$0xff] }
  0x30   : > { %366 = vst.msk [vmem:[#allocation2 + $0x198] sm:$0x1] %vm315_vm2, %v2947_v1  ;;  %v2420_v8 = vld [vmem:[%s3197_s11 + $0x78] sm:$0xff]  ;;  %v408_v19 = vmul.f32 %v3191_v5, %v394_v56 }
  0x31   : > { %568 = vst.msk [vmem:[#allocation3 + $0x8] sm:$0xff] %vm566_vm3, %v2947_v1  ;;  %567 = vst.msk [vmem:[#allocation3] sm:$0xff] %vm566_vm3, %v2947_v1  ;;  %v456_v26 = vmul.f32 %v2420_v8, %v3191_v5  ;;  %v2506_v45 = vld [vmem:[%s3827_s3 + $0x1c] sm:$0xf] }
  0x32   : > { %569 = vst.msk [vmem:[#allocation3 + $0x10] sm:$0xff] %vm566_vm3, %v2947_v1  ;;  %570 = vst.msk [vmem:[#allocation3 + $0x18] sm:$0xff] %vm566_vm3, %v2947_v1 }
  0x33   : > { %571 = vst.msk [vmem:[#allocation3 + $0x20] sm:$0xff] %vm566_vm3, %v2947_v1  ;;  %572 = vst.msk [vmem:[#allocation3 + $0x28] sm:$0xff] %vm566_vm3, %v2947_v1 }
  0x34   : > { %573 = vst.msk [vmem:[#allocation3 + $0x30] sm:$0xff] %vm566_vm3, %v2947_v1  ;;  %574 = vst.msk [vmem:[#allocation3 + $0x38] sm:$0xff] %vm566_vm3, %v2947_v1  ;;  %v429_v1 = vmax.f32 %v421_v55, 0.0  ;;  %v2436_v55 = vld [vmem:[%s3197_s11 + $0xf8] sm:$0xff] }
  0x35   : > { %432 = vst.msk [vmem:[#allocation2 + $0x11] sm:$0xff] %vm313_vm1, %v423_v33  ;;  %433 = vst.msk [vmem:[#allocation2 + $0x21] sm:$0xff] %vm313_vm1, %v424_v34  ;;  %v503_v33 = vadd.f32 %v3202_v6, %v495_v20  ;;  %v2428_v34 = vld [vmem:[%s3197_s11 + $0xb8] sm:$0xff] }
  0x36   : > { %434 = vst.msk [vmem:[#allocation2 + $0x31] sm:$0xff] %vm313_vm1, %v425_v35  ;;  %435 = vst.msk [vmem:[#allocation2 + $0x41] sm:$0xff] %vm313_vm1, %v426_v40  ;;  %v2432_v40 = vld [vmem:[%s3197_s11 + $0xd8] sm:$0xff]  ;;  %v498_v51 = vmul.f32 %v2428_v34, %v3191_v5 }
  0x37   : > { %436 = vst.msk [vmem:[#allocation2 + $0x51] sm:$0xff] %vm313_vm1, %v427_v41  ;;  %474 = vst.msk [vmem:[#allocation2 + $0xa0] sm:$0xff] %vm313_vm1, %v465_v42  ;;  %v510_v42 = vmax.f32 %v502_v31, 0.0  ;;  %v511_v43 = vmax.f32 %v503_v33, 0.0  ;;  %v464_v33 = vadd.f32 %v3202_v6, %v456_v26 }
  0x38   : > { %437 = vst.msk [vmem:[#allocation2 + $0x61] sm:$0xff] %vm313_vm1, %v428_v49  ;;  %475 = vst.msk [vmem:[#allocation2 + $0xb0] sm:$0xff] %vm313_vm1, %v466_v54  ;;  %v549_v49 = vmax.f32 %v3314_v37, 0.0  ;;  %v536_v54 = vmul.f32 %v2432_v40, %v3191_v5  ;;  %v506_v60 = vadd.f32 %v3202_v6, %v498_v51  ;;  %v583_v38 = vld [vmem:[#allocation3] sm:$0xff] }
  0x39   : > { %438 = vst.msk [vmem:[#allocation2 + $0x71] sm:$0xff] %vm313_vm1, %v429_v1  ;;  %476 = vst.msk [vmem:[#allocation2 + $0xc0] sm:$0xff] %vm313_vm1, %v467_v3  ;;  %v3376_v1 = vadd.f32 %v3202_v6, %v535_v53  ;;  %v472_v40 = vmax.f32 %v464_v33, 0.0 }
  0x3a   : > { %477 = vst.msk [vmem:[#allocation2 + $0xd0] sm:$0xff] %vm313_vm1, %v468_v7  ;;  %478 = vst.msk [vmem:[#allocation2 + $0xe0] sm:$0xff] %vm313_vm1, %v469_v12  ;;  %v3379_v3 = vadd.f32 %v3202_v6, %v536_v54  ;;  %v539_v7 = vmul.f32 %v2435_v52, %v3191_v5  ;;  %v514_v10 = vmax.f32 %v506_v60, 0.0  ;;  %v3391_v12 = vadd.f32 %v3202_v6, %v538_v62 }
  0x3b   : > { %479 = vst.msk [vmem:[#allocation2 + $0xf0] sm:$0xff] %vm313_vm1, %v470_v13  ;;  %480 = vst.msk [vmem:[#allocation2 + $0x100] sm:$0xff] %vm313_vm1, %v471_v14  ;;  %v540_v13 = vmul.f32 %v2436_v55, %v3191_v5  ;;  %v551_v15 = vmax.f32 %v3376_v1, 0.0 }
  0x3c   : > { %v3281_v21 = vld [vmem:[#allocation2 + $0x10] sm:$0xff]  ;;  %v3283_v22 = vld [vmem:[#allocation2 + $0x20] sm:$0xff]  ;;  %516 = vst.msk [vmem:[#allocation2 + $0x121] sm:$0xff] %vm313_vm1, %v507_v23  ;;  %517 = vst.msk [vmem:[#allocation2 + $0x131] sm:$0xff] %vm313_vm1, %v508_v29  ;;  %v552_v17 = vmax.f32 %v3379_v3, 0.0  ;;  %v3402_v18 = vadd.f32 %v3202_v6, %v539_v7  ;;  %v553_v23 = vmax.f32 %v3388_v11, 0.0 }
  0x3d   : > { %2639 = vmatmul.mubr.msk.f32.vlgmr.msra.gmra.mxu0 %vm313_vm1, %v3281_v21  ;;  %v3307_v35 = vld [vmem:[#allocation2 + $0x30] sm:$0xff]  ;;  %v3321_v41 = vld [vmem:[#allocation2 + $0x40] sm:$0xff]  ;;  %519 = vst.msk [vmem:[#allocation2 + $0x151] sm:$0xff] %vm313_vm1, %v510_v42  ;;  %520 = vst.msk [vmem:[#allocation2 + $0x161] sm:$0xff] %vm313_vm1, %v511_v43  ;;  %v554_v24 = vmax.f32 %v3391_v12, 0.0  ;;  %v3413_v25 = vadd.f32 %v3202_v6, %v540_v13 }
  0x3e   : > { %v3294_v28 = vld [vmem:[#allocation2 + $0xa0] sm:$0xff]  ;;  %2641 = vmatprep.mubr.msk.f32.mxu0 %vm313_vm1, %v3283_v22  ;;  %2665 = vmatpush3.msk.msra.mxu0 %vm616_vm0, %v3158_v2  ;;  %v509_v2 = vmax.f32 %v501_v30, 0.0  ;;  %v3353_v57 = vld [vmem:[#allocation2 + $0x50] sm:$0xff]  ;;  %521 = vst.msk [vmem:[#allocation2 + $0x171] sm:$0xff] %vm313_vm1, %v512_v48  ;;  %558 = vst.msk [vmem:[#allocation2 + $0x1b0] sm:$0xff] %vm313_vm1, %v549_v49  ;;  %v555_v29 = vmax.f32 %v3402_v18, 0.0  ;;  %v422_v30 = vadd.f32 %v3202_v6, %v408_v19 }
  0x3f   : > { %2653 = vmatmul.mubr.msk.f32.vlgmr.msra.gmra.mxu1 %vm313_vm1, %v3294_v28  ;;  %2692 = vmatprep.subr.msk.mxu0 %vm616_vm0, %v3275_v16  ;;  %v3331_v47 = vld [vmem:[#allocation2 + $0xb0] sm:$0xff]  ;;  %559 = vst.msk [vmem:[#allocation2 + $0x1c0] sm:$0xff] %vm313_vm1, %v550_v50  ;;  %v3371_v63 = vld [vmem:[#allocation2 + $0x60] sm:$0xff]  ;;  %523 = vst.msk [vmem:[#allocation2 + $0x191] sm:$0xff] %vm313_vm1, %v514_v10  ;;  %v556_v31 = vmax.f32 %v3413_v25, 0.0 }
  0x40   : > { %2679 = vmatpush3.msk.msra.mxu1 %vm616_vm0, %v3185_v4  ;;  %2655 = vmatprep.mubr.msk.f32.mxu1 %vm313_vm1, %v3331_v47  ;;  %518 = vst.msk [vmem:[#allocation2 + $0x141] sm:$0xff] %vm313_vm1, %v509_v2  ;;  %v505_v4 = vadd.f32 %v3202_v6, %v497_v44  ;;  %v3355_v58 = vld [vmem:[#allocation2 + $0xc0] sm:$0xff]  ;;  %v3407_v20 = vld [vmem:[#allocation2 + $0x70] sm:$0xff]  ;;  %560 = vst.msk [vmem:[#allocation2 + $0x1d0] sm:$0xff] %vm313_vm1, %v551_v15  ;;  %v430_v36 = vmax.f32 %v422_v30, 0.0 }
  0x41   : > { %2642 = vmatmul.mubr.msk.f32.gmra.mxu0 %vm313_vm1, %v3307_v35  ;;  %v3357_v59 = vld [vmem:[#allocation2 + $0xd0] sm:$0xff]  ;;  %2706 = vmatprep.subr.msk.mxu1 %vm616_vm0, %v3301_v32  ;;  %v3385_v9 = vld [vmem:[#allocation2 + $0xe0] sm:$0xff]  ;;  %561 = vst.msk [vmem:[#allocation2 + $0x1e0] sm:$0xff] %vm313_vm1, %v552_v17  ;;  %562 = vst.msk [vmem:[#allocation2 + $0x1f0] sm:$0xff] %vm313_vm1, %v553_v23 }
  0x42   : > { %2644 = vmatprep.mubr.msk.f32.mxu0 %vm313_vm1, %v3321_v41  ;;  %v513_v0 = vmax.f32 %v505_v4, 0.0  ;;  %v3396_v14 = vld [vmem:[#allocation2 + $0xf0] sm:$0xff]  ;;  %v3428_v5 = vld [vmem:[#allocation2 + $0x100] sm:$0xff]  ;;  %563 = vst.msk [vmem:[#allocation2 + $0x200] sm:$0xff] %vm313_vm1, %v554_v24  ;;  %564 = vst.msk [vmem:[#allocation2 + $0x210] sm:$0xff] %vm313_vm1, %v555_v29 }
  0x43   : > { %2656 = vmatmul.mubr.msk.f32.gmra.mxu1 %vm313_vm1, %v3355_v58  ;;  %v1074_v34 = vld [vmem:[#allocation2 + $0x120] sm:$0xff]  ;;  %v3444_v39 = vld [vmem:[#allocation2 + $0x11] sm:$0xff]  ;;  %565 = vst.msk [vmem:[#allocation2 + $0x220] sm:$0xff] %vm313_vm1, %v556_v31  ;;  %439 = vst.msk [vmem:[#allocation2 + $0x81] sm:$0xff] %vm313_vm1, %v430_v36 }
  0x44   : > { %2658 = vmatprep.mubr.msk.f32.mxu1 %vm313_vm1, %v3357_v59  ;;  %522 = vst.msk [vmem:[#allocation2 + $0x181] sm:$0xff] %vm313_vm1, %v513_v0  ;;  %v3451_v6 = vld [vmem:[#allocation2 + $0x21] sm:$0xff]  ;;  %v1075_v2 = vld [vmem:[#allocation2 + $0x130] sm:$0xff]  ;;  %v2496_v42 = vld [vmem:[%s3827_s3 + $0x18] sm:$0xf] }
  0x45   : > { %2645 = vmatmul.mubr.msk.f32.gmra.mxu0 %vm313_vm1, %v3353_v57  ;;  %481 = vst.msk [vmem:[#allocation2 + $0x110] sm:$0xff] %vm313_vm1, %v472_v40  ;;  %v3463_v44 = vld [vmem:[#allocation2 + $0x31] sm:$0xff]  ;;  %v3470_v46 = vld [vmem:[#allocation2 + $0x41] sm:$0xff] }
  0x46   : > { %2647 = vmatprep.mubr.msk.f32.mxu0 %vm313_vm1, %v3371_v63  ;;  %v1077_v48 = vld [vmem:[#allocation2 + $0x150] sm:$0xff]  ;;  %v3484_v52 = vld [vmem:[#allocation2 + $0x61] sm:$0xff] }
  0x47   : > { %2659 = vmatmul.mubr.msk.f32.gmra.mxu1 %vm313_vm1, %v3385_v9  ;;  %v1076_v43 = vld [vmem:[#allocation2 + $0x140] sm:$0xff]  ;;  %v3482_v51 = vld [vmem:[#allocation2 + $0x51] sm:$0xff] }
  0x48   : > { %2661 = vmatprep.mubr.msk.f32.mxu1 %vm313_vm1, %v3396_v14  ;;  %v1079_v4 = vld [vmem:[#allocation2 + $0x170] sm:$0xff]  ;;  %v1406_v56 = vld [vmem:[#allocation2 + $0x121] sm:$0xff] }
  0x49   : > { %2648 = vmatmul.mubr.msk.f32.gmra.mxu0 %vm313_vm1, %v3407_v20  ;;  %v3492_v53 = vld [vmem:[#allocation2 + $0x71] sm:$0xff]  ;;  %v1241_v60 = vld [vmem:[#allocation2 + $0x1c0] sm:$0xff] }
  0x4a   : > { %2666 = vmatprep.mubr.msk.f32.mxu0 %vm313_vm1, %v908_v27  ;;  %v1240_v54 = vld [vmem:[#allocation2 + $0x1b0] sm:$0xff]  ;;  %v2516_v0 = vld [vmem:[%s3827_s3 + $0x20] sm:$0xf] }
  0x4b   : > { %2662 = vmatmul.mubr.msk.f32.gmra.mxu1 %vm313_vm1, %v3428_v5  ;;  %v1081_v55 = vld [vmem:[#allocation2 + $0x190] sm:$0xff]  ;;  %v1408_v7 = vld [vmem:[#allocation2 + $0x141] sm:$0xff] }
  0x4c   : > { %2680 = vmatprep.mubr.msk.f32.mxu1 %vm313_vm1, %v1074_v34  ;;  %v1242_v61 = vld [vmem:[#allocation2 + $0x1d0] sm:$0xff]  ;;  %v1243_v8 = vld [vmem:[#allocation2 + $0x1e0] sm:$0xff] }
  0x4d   : > { %2667 = vmatmul.mubr.msk.f32.vlgmr.msra.gmra.mxu0 %vm313_vm1, %v3444_v39  ;;  %v1407_v62 = vld [vmem:[#allocation2 + $0x131] sm:$0xff]  ;;  %v2086_v10 = vld [vmem:[%s3828_s4] sm:$0xf] }
  0x4e   : > { %2669 = vmatprep.mubr.msk.f32.mxu0 %vm313_vm1, %v3451_v6  ;;  %2693 = vmatpush3.msk.msra.mxu0 %vm616_vm0, %v3275_v16  ;;  %v1078_v16 = vld [vmem:[#allocation2 + $0x160] sm:$0xff]  ;;  %v1244_v13 = vld [vmem:[#allocation2 + $0x1f0] sm:$0xff] }
  0x4f   : > { %2681 = vmatmul.mubr.msk.f32.vlgmr.msra.gmra.mxu1 %vm313_vm1, %v1075_v2  ;;  %2720 = vmatprep.subr.msk.mxu0 %vm616_vm0, %v2496_v42  ;;  %v1409_v19 = vld [vmem:[#allocation2 + $0x151] sm:$0xff]  ;;  %v1410_v26 = vld [vmem:[#allocation2 + $0x161] sm:$0xff] }
  0x50   : > { %2683 = vmatprep.mubr.msk.f32.mxu1 %vm313_vm1, %v1076_v43  ;;  %2707 = vmatpush3.msk.msra.mxu1 %vm616_vm0, %v3301_v32  ;;  %v1080_v32 = vld [vmem:[#allocation2 + $0x180] sm:$0xff]  ;;  %v1246_v30 = vld [vmem:[#allocation2 + $0x210] sm:$0xff] }
  0x51   : > { %2670 = vmatmul.mubr.msk.f32.gmra.mxu0 %vm313_vm1, %v3463_v44  ;;  %2734 = vmatprep.subr.msk.mxu1 %vm616_vm0, %v2506_v45  ;;  %v1245_v27 = vld [vmem:[#allocation2 + $0x200] sm:$0xff]  ;;  %v1411_v33 = vld [vmem:[#allocation2 + $0x171] sm:$0xff] }
  0x52   : > { %2672 = vmatprep.mubr.msk.f32.mxu0 %vm313_vm1, %v3470_v46  ;;  %v1412_v34 = vld [vmem:[#allocation2 + $0x181] sm:$0xff]  ;;  %v1413_v40 = vld [vmem:[#allocation2 + $0x191] sm:$0xff] }
  0x53   : > { %2684 = vmatmul.mubr.msk.f32.gmra.mxu1 %vm313_vm1, %v1077_v48  ;;  %v1247_v36 = vld [vmem:[#allocation2 + $0x220] sm:$0xff] }
  0x54   : > { %2686 = vmatprep.mubr.msk.f32.mxu1 %vm313_vm1, %v1078_v16 }
  0x55   : > { %2673 = vmatmul.mubr.msk.f32.gmra.mxu0 %vm313_vm1, %v3482_v51 }
  0x56   : > { %2675 = vmatprep.mubr.msk.f32.mxu0 %vm313_vm1, %v3484_v52 }
  0x57   : > { %2687 = vmatmul.mubr.msk.f32.gmra.mxu1 %vm313_vm1, %v1079_v4 }
  0x58   : > { %2689 = vmatprep.mubr.msk.f32.mxu1 %vm313_vm1, %v1080_v32 }
  0x59   : > { %2676 = vmatmul.mubr.msk.f32.gmra.mxu0 %vm313_vm1, %v3492_v53 }
  0x5a   : > { %2694 = vmatprep.mubr.msk.f32.mxu0 %vm313_vm1, %v1240_v54 }
  0x5b   : > { %2690 = vmatmul.mubr.msk.f32.gmra.mxu1 %vm313_vm1, %v1081_v55 }
  0x5c   : > { %2708 = vmatprep.mubr.msk.f32.mxu1 %vm313_vm1, %v1406_v56 }
  0x5d   : > { %2695 = vmatmul.mubr.msk.f32.vlgmr.msra.gmra.mxu0 %vm313_vm1, %v1241_v60 }
  0x5e   : > { %2697 = vmatprep.mubr.msk.f32.mxu0 %vm313_vm1, %v1242_v61  ;;  %2721 = vmatpush3.msk.msra.mxu0 %vm616_vm0, %v2496_v42 }
  0x5f   : > { %2709 = vmatmul.mubr.msk.f32.vlgmr.msra.gmra.mxu1 %vm313_vm1, %v1407_v62  ;;  %2748 = vmatprep.subr.msk.mxu0 %vm616_vm0, %v2516_v0 }
  0x60   : > { %2711 = vmatprep.mubr.msk.f32.mxu1 %vm313_vm1, %v1408_v7  ;;  %2735 = vmatpush3.msk.msra.mxu1 %vm616_vm0, %v2506_v45 }
  0x61   : > { %2698 = vmatmul.mubr.msk.f32.gmra.mxu0 %vm313_vm1, %v1243_v8  ;;  %2762 = vmatprep.subr.msk.mxu1 %vm616_vm0, %v2086_v10 }
  0x62   : > { %2700 = vmatprep.mubr.msk.f32.mxu0 %vm313_vm1, %v1244_v13 }
  0x63   : > { %2712 = vmatmul.mubr.msk.f32.gmra.mxu1 %vm313_vm1, %v1409_v19 }
  0x64   : > { %2714 = vmatprep.mubr.msk.f32.mxu1 %vm313_vm1, %v1410_v26 }
  0x65   : > { %2701 = vmatmul.mubr.msk.f32.gmra.mxu0 %vm313_vm1, %v1245_v27 }
  0x66   : > { %2703 = vmatprep.mubr.msk.f32.mxu0 %vm313_vm1, %v1246_v30 }
  0x67   : > { %2715 = vmatmul.mubr.msk.f32.gmra.mxu1 %vm313_vm1, %v1411_v33 }
  0x68   : > { %2717 = vmatprep.mubr.msk.f32.mxu1 %vm313_vm1, %v1412_v34 }
  0x69   : > { %2704 = vmatmul.mubr.msk.f32.gmra.mxu0 %vm313_vm1, %v1247_v36 }
  0x6a   : > { %2722 = vmatprep.mubr.msk.f32.mxu0 %vm313_vm1, %v3281_v21  ;;  %v1579_v21 = vld [vmem:[#allocation2 + $0x80] sm:$0xff] }
  0x6b   : > { %2718 = vmatmul.mubr.msk.f32.gmra.mxu1 %vm313_vm1, %v1413_v40 }
  0x6c   : > { %2736 = vmatprep.mubr.msk.f32.mxu1 %vm313_vm1, %v3294_v28  ;;  %v1911_v28 = vld [vmem:[#allocation2 + $0x81] sm:$0xff] }
  0x6d   : > { %2723 = vmatmul.mubr.msk.f32.vlgmr.msra.gmra.mxu0 %vm313_vm1, %v3283_v22  ;;  %v1745_v22 = vld [vmem:[#allocation2 + $0x110] sm:$0xff] }
  0x6e   : > { %2725 = vmatprep.mubr.msk.f32.mxu0 %vm313_vm1, %v3307_v35  ;;  %2749 = vmatpush3.msk.msra.mxu0 %vm616_vm0, %v2516_v0  ;;  %v584_v35 = vld [vmem:[#allocation3 + $0x8] sm:$0xff] }
  0x6f   : > { %2737 = vmatmul.mubr.msk.f32.vlgmr.msra.gmra.mxu1 %vm313_vm1, %v3331_v47 }
  0x70   : > { %2739 = vmatprep.mubr.msk.f32.mxu1 %vm313_vm1, %v3355_v58  ;;  %2763 = vmatpush3.msk.msra.mxu1 %vm616_vm0, %v2086_v10 }
  0x71   : > { %2726 = vmatmul.mubr.msk.f32.gmra.mxu0 %vm313_vm1, %v3321_v41 }
  0x72   : > { %2728 = vmatprep.mubr.msk.f32.mxu0 %vm313_vm1, %v3353_v57 }
  0x73   : > { %2740 = vmatmul.mubr.msk.f32.gmra.mxu1 %vm313_vm1, %v3357_v59  ;;  %v585_v59 = vld [vmem:[#allocation3 + $0x10] sm:$0xff] }
  0x74   : > { %2742 = vmatprep.mubr.msk.f32.mxu1 %vm313_vm1, %v3385_v9  ;;  %v588_v9 = vld [vmem:[#allocation3 + $0x28] sm:$0xff] }
  0x75   : > { %2729 = vmatmul.mubr.msk.f32.gmra.mxu0 %vm313_vm1, %v3371_v63 }
  0x76   : > { %2731 = vmatprep.mubr.msk.f32.mxu0 %vm313_vm1, %v3407_v20 }
  0x77   : > { %2743 = vmatmul.mubr.msk.f32.gmra.mxu1 %vm313_vm1, %v3396_v14 }
  0x78   : > { %2745 = vmatprep.mubr.msk.f32.mxu1 %vm313_vm1, %v3428_v5 }
  0x79   : > { %2732 = vmatmul.mubr.msk.f32.gmra.mxu0 %vm313_vm1, %v1579_v21 }
  0x7a   : > { %2750 = vmatprep.mubr.msk.f32.mxu0 %vm313_vm1, %v3444_v39 }
  0x7b   : > { %2746 = vmatmul.mubr.msk.f32.gmra.mxu1 %vm313_vm1, %v1745_v22 }
  0x7c   : > { %2764 = vmatprep.mubr.msk.f32.mxu1 %vm313_vm1, %v549_v49  ;;  %v586_v49 = vld [vmem:[#allocation3 + $0x18] sm:$0xff] }
  0x7d   : > { %2751 = vmatmul.mubr.msk.f32.vlgmr.msra.gmra.mxu0 %vm313_vm1, %v3451_v6  ;;  %v589_v6 = vld [vmem:[#allocation3 + $0x30] sm:$0xff] }
  0x7e   : > { %2753 = vmatprep.mubr.msk.f32.mxu0 %vm313_vm1, %v3463_v44 }
  0x7f   : > { %2765 = vmatmul.mubr.msk.f32.vlgmr.msra.gmra.mxu1 %vm313_vm1, %v550_v50 }
  0x80   : > { %2767 = vmatprep.mubr.msk.f32.mxu1 %vm313_vm1, %v551_v15  ;;  %v587_v15 = vld [vmem:[#allocation3 + $0x20] sm:$0xff] }
  0x81   : > { %2754 = vmatmul.mubr.msk.f32.gmra.mxu0 %vm313_vm1, %v3470_v46 }
  0x82   : > { %2756 = vmatprep.mubr.msk.f32.mxu0 %vm313_vm1, %v3482_v51 }
  0x83   : > { %2768 = vmatmul.mubr.msk.f32.gmra.mxu1 %vm313_vm1, %v552_v17 }
  0x84   : > { %2770 = vmatprep.mubr.msk.f32.mxu1 %vm313_vm1, %v553_v23 }
  0x85   : > { %2757 = vmatmul.mubr.msk.f32.gmra.mxu0 %vm313_vm1, %v3484_v52 }
  0x86   : > { %2759 = vmatprep.mubr.msk.f32.mxu0 %vm313_vm1, %v3492_v53 }
  0x87   : > { %2771 = vmatmul.mubr.msk.f32.gmra.mxu1 %vm313_vm1, %v554_v24  ;;  %v590_v24 = vld [vmem:[#allocation3 + $0x38] sm:$0xff] }
  0x88   : > { %2773 = vmatprep.mubr.msk.f32.mxu1 %vm313_vm1, %v555_v29 }
  0x89   : > { %2760 = vmatmul.mubr.msk.f32.gmra.mxu0 %vm313_vm1, %v1911_v28 }
  0x8b   : > { %2774 = vmatmul.mubr.msk.f32.gmra.mxu1 %vm313_vm1, %v556_v31 }
  0xfd   : > { %v2640_v37 = vpop.f32.mrf.mxu0 }
  0xfe   : > { %v726_v41 = vadd.f32 %v2640_v37, %v584_v35 }
  0xff   : > { %v686_v47 = vpop.f32.mrf.mxu0  ;;  %v2654_v50 = vpop.f32.mrf.mxu1 }
 0x100   : > { %734 = vst.msk [vmem:[#allocation3 + $0x8] sm:$0xff] %vm566_vm3, %v726_v41  ;;  %v725_v57 = vadd.f32 %v686_v47, %v583_v38 }
 0x101   : > { %v2643_v58 = vpop.f32.mrf.mxu0  ;;  %v853_v63 = vpop.f32.mrf.mxu1 }
 0x102   : > { %733 = vst.msk [vmem:[#allocation3] sm:$0xff] %vm566_vm3, %v725_v57  ;;  %v728_v1 = vadd.f32 %v2643_v58, %v586_v49 }
 0x103   : > { %v696_v3 = vpop.f32.mrf.mxu0  ;;  %v2657_v11 = vpop.f32.mrf.mxu1 }
 0x104   : > { %736 = vst.msk [vmem:[#allocation3 + $0x18] sm:$0xff] %vm566_vm3, %v728_v1  ;;  %v727_v12 = vadd.f32 %v696_v3, %v585_v59 }
 0x105   : > { %v2646_v14 = vpop.f32.mrf.mxu0  ;;  %v863_v17 = vpop.f32.mrf.mxu1 }
 0x106   : > { %735 = vst.msk [vmem:[#allocation3 + $0x10] sm:$0xff] %vm566_vm3, %v727_v12  ;;  %v730_v18 = vadd.f32 %v2646_v14, %v588_v9 }
 0x107   : > { %v751_v20 = vld [vmem:[#allocation3 + $0x8] sm:$0xff]  ;;  %v706_v23 = vpop.f32.mrf.mxu0  ;;  %v2660_v25 = vpop.f32.mrf.mxu1 }
 0x108   : > { %738 = vst.msk [vmem:[#allocation3 + $0x28] sm:$0xff] %vm566_vm3, %v730_v18  ;;  %v893_v29 = vadd.f32 %v2654_v50, %v751_v20  ;;  %v729_v5 = vadd.f32 %v706_v23, %v587_v15 }
 0x109   : > { %v750_v31 = vld [vmem:[#allocation3] sm:$0xff]  ;;  %v2649_v39 = vpop.f32.mrf.mxu0  ;;  %v873_v2 = vpop.f32.mrf.mxu1 }
 0x10a   : > { %901 = vst.msk [vmem:[#allocation3 + $0x8] sm:$0xff] %vm566_vm3, %v893_v29  ;;  %737 = vst.msk [vmem:[#allocation3 + $0x20] sm:$0xff] %vm566_vm3, %v729_v5  ;;  %v892_v42 = vadd.f32 %v853_v63, %v750_v31  ;;  %v732_v43 = vadd.f32 %v2649_v39, %v590_v24 }
 0x10b   : > { %v753_v44 = vld [vmem:[#allocation3 + $0x18] sm:$0xff]  ;;  %v716_v45 = vpop.f32.mrf.mxu0  ;;  %v2663_v46 = vpop.f32.mrf.mxu1 }
 0x10c   : > { %900 = vst.msk [vmem:[#allocation3] sm:$0xff] %vm566_vm3, %v892_v42  ;;  %740 = vst.msk [vmem:[#allocation3 + $0x38] sm:$0xff] %vm566_vm3, %v732_v43  ;;  %v895_v48 = vadd.f32 %v2657_v11, %v753_v44  ;;  %v731_v16 = vadd.f32 %v716_v45, %v589_v6 }
 0x10d   : > { %v752_v51 = vld [vmem:[#allocation3 + $0x10] sm:$0xff]  ;;  %v2668_v52 = vpop.f32.mrf.mxu0  ;;  %v883_v4 = vpop.f32.mrf.mxu1 }
 0x10e   : > { %903 = vst.msk [vmem:[#allocation3 + $0x18] sm:$0xff] %vm566_vm3, %v895_v48  ;;  %739 = vst.msk [vmem:[#allocation3 + $0x30] sm:$0xff] %vm566_vm3, %v731_v16  ;;  %v894_v32 = vadd.f32 %v863_v17, %v752_v51 }
 0x10f   : > { %v755_v53 = vld [vmem:[#allocation3 + $0x28] sm:$0xff]  ;;  %v1019_v54 = vpop.f32.mrf.mxu0  ;;  %v2682_v55 = vpop.f32.mrf.mxu1 }
 0x110   : > { %902 = vst.msk [vmem:[#allocation3 + $0x10] sm:$0xff] %vm566_vm3, %v894_v32  ;;  %v897_v56 = vadd.f32 %v2660_v25, %v755_v53 }
 0x111   : > { %v754_v60 = vld [vmem:[#allocation3 + $0x20] sm:$0xff]  ;;  %v917_v61 = vld [vmem:[#allocation3 + $0x8] sm:$0xff]  ;;  %v2671_v62 = vpop.f32.mrf.mxu0  ;;  %v1185_v0 = vpop.f32.mrf.mxu1 }
 0x112   : > { %905 = vst.msk [vmem:[#allocation3 + $0x28] sm:$0xff] %vm566_vm3, %v897_v56  ;;  %v896_v7 = vadd.f32 %v873_v2, %v754_v60  ;;  %v1059_v8 = vadd.f32 %v2668_v52, %v917_v61 }
 0x113   : > { %v757_v10 = vld [vmem:[#allocation3 + $0x38] sm:$0xff]  ;;  %v916_v13 = vld [vmem:[#allocation3] sm:$0xff]  ;;  %v1029_v19 = vpop.f32.mrf.mxu0  ;;  %v2685_v26 = vpop.f32.mrf.mxu1 }
 0x114   : > { %904 = vst.msk [vmem:[#allocation3 + $0x20] sm:$0xff] %vm566_vm3, %v896_v7  ;;  %1067 = vst.msk [vmem:[#allocation3 + $0x8] sm:$0xff] %vm566_vm3, %v1059_v8  ;;  %v899_v27 = vadd.f32 %v2663_v46, %v757_v10  ;;  %v1058_v30 = vadd.f32 %v1019_v54, %v916_v13 }
 0x115   : > { %v756_v33 = vld [vmem:[#allocation3 + $0x30] sm:$0xff]  ;;  %v919_v34 = vld [vmem:[#allocation3 + $0x18] sm:$0xff]  ;;  %v2674_v36 = vpop.f32.mrf.mxu0  ;;  %v1195_v40 = vpop.f32.mrf.mxu1 }
 0x116   : > { %907 = vst.msk [vmem:[#allocation3 + $0x38] sm:$0xff] %vm566_vm3, %v899_v27  ;;  %1066 = vst.msk [vmem:[#allocation3] sm:$0xff] %vm566_vm3, %v1058_v30  ;;  %v898_v21 = vadd.f32 %v883_v4, %v756_v33  ;;  %v1061_v22 = vadd.f32 %v2671_v62, %v919_v34 }
 0x117   : > { %v918_v28 = vld [vmem:[#allocation3 + $0x10] sm:$0xff]  ;;  %v1039_v35 = vpop.f32.mrf.mxu0  ;;  %v2688_v37 = vpop.f32.mrf.mxu1 }
 0x118   : > { %906 = vst.msk [vmem:[#allocation3 + $0x30] sm:$0xff] %vm566_vm3, %v898_v21  ;;  %1069 = vst.msk [vmem:[#allocation3 + $0x18] sm:$0xff] %vm566_vm3, %v1061_v22  ;;  %v1060_v38 = vadd.f32 %v1029_v19, %v918_v28 }
 0x119   : > { %v921_v41 = vld [vmem:[#allocation3 + $0x28] sm:$0xff]  ;;  %v2677_v47 = vpop.f32.mrf.mxu0  ;;  %v1205_v49 = vpop.f32.mrf.mxu1 }
 0x11a   : > { %1068 = vst.msk [vmem:[#allocation3 + $0x10] sm:$0xff] %vm566_vm3, %v1060_v38  ;;  %v1063_v50 = vadd.f32 %v2674_v36, %v921_v41 }
 0x11b   : > { %v920_v57 = vld [vmem:[#allocation3 + $0x20] sm:$0xff]  ;;  %v1083_v58 = vld [vmem:[#allocation3 + $0x8] sm:$0xff]  ;;  %v1049_v59 = vpop.f32.mrf.mxu0  ;;  %v2691_v63 = vpop.f32.mrf.mxu1 }
 0x11c   : > { %1071 = vst.msk [vmem:[#allocation3 + $0x28] sm:$0xff] %vm566_vm3, %v1063_v50  ;;  %v1062_v1 = vadd.f32 %v1039_v35, %v920_v57  ;;  %v1225_v3 = vadd.f32 %v2682_v55, %v1083_v58 }
 0x11d   : > { %v923_v9 = vld [vmem:[#allocation3 + $0x38] sm:$0xff]  ;;  %v1082_v11 = vld [vmem:[#allocation3] sm:$0xff]  ;;  %v2696_v12 = vpop.f32.mrf.mxu0  ;;  %v1215_v14 = vpop.f32.mrf.mxu1 }
 0x11e   : > { %1070 = vst.msk [vmem:[#allocation3 + $0x20] sm:$0xff] %vm566_vm3, %v1062_v1  ;;  %1233 = vst.msk [vmem:[#allocation3 + $0x8] sm:$0xff] %vm566_vm3, %v1225_v3  ;;  %v1065_v15 = vadd.f32 %v2677_v47, %v923_v9  ;;  %v1224_v17 = vadd.f32 %v1185_v0, %v1082_v11 }
 0x11f   : > { %v922_v18 = vld [vmem:[#allocation3 + $0x30] sm:$0xff]  ;;  %v1085_v20 = vld [vmem:[#allocation3 + $0x18] sm:$0xff]  ;;  %v1351_v23 = vpop.f32.mrf.mxu0  ;;  %v2710_v24 = vpop.f32.mrf.mxu1 }
 0x120   : > { %1073 = vst.msk [vmem:[#allocation3 + $0x38] sm:$0xff] %vm566_vm3, %v1065_v15  ;;  %1232 = vst.msk [vmem:[#allocation3] sm:$0xff] %vm566_vm3, %v1224_v17  ;;  %v1064_v25 = vadd.f32 %v1049_v59, %v922_v18  ;;  %v1227_v29 = vadd.f32 %v2685_v26, %v1085_v20 }
 0x121   : > { %v1084_v5 = vld [vmem:[#allocation3 + $0x10] sm:$0xff]  ;;  %v2699_v31 = vpop.f32.mrf.mxu0  ;;  %v1517_v39 = vpop.f32.mrf.mxu1 }
 0x122   : > { %1072 = vst.msk [vmem:[#allocation3 + $0x30] sm:$0xff] %vm566_vm3, %v1064_v25  ;;  %1235 = vst.msk [vmem:[#allocation3 + $0x18] sm:$0xff] %vm566_vm3, %v1227_v29  ;;  %v1226_v6 = vadd.f32 %v1195_v40, %v1084_v5 }
 0x123   : > { %v1087_v2 = vld [vmem:[#allocation3 + $0x28] sm:$0xff]  ;;  %v1361_v42 = vpop.f32.mrf.mxu0  ;;  %v2713_v43 = vpop.f32.mrf.mxu1 }
 0x124   : > { %1234 = vst.msk [vmem:[#allocation3 + $0x10] sm:$0xff] %vm566_vm3, %v1226_v6  ;;  %v1229_v44 = vadd.f32 %v2688_v37, %v1087_v2 }
 0x125   : > { %v1086_v45 = vld [vmem:[#allocation3 + $0x20] sm:$0xff]  ;;  %v1249_v46 = vld [vmem:[#allocation3 + $0x8] sm:$0xff]  ;;  %v2702_v48 = vpop.f32.mrf.mxu0  ;;  %v1527_v16 = vpop.f32.mrf.mxu1 }
 0x126   : > { %1237 = vst.msk [vmem:[#allocation3 + $0x28] sm:$0xff] %vm566_vm3, %v1229_v44  ;;  %v1228_v51 = vadd.f32 %v1205_v49, %v1086_v45  ;;  %v1391_v52 = vadd.f32 %v2696_v12, %v1249_v46 }
 0x127   : > { %v1089_v4 = vld [vmem:[#allocation3 + $0x38] sm:$0xff]  ;;  %v1248_v32 = vld [vmem:[#allocation3] sm:$0xff]  ;;  %v1371_v53 = vpop.f32.mrf.mxu0  ;;  %v2716_v54 = vpop.f32.mrf.mxu1 }
 0x128   : > { %1236 = vst.msk [vmem:[#allocation3 + $0x20] sm:$0xff] %vm566_vm3, %v1228_v51  ;;  %1399 = vst.msk [vmem:[#allocation3 + $0x8] sm:$0xff] %vm566_vm3, %v1391_v52  ;;  %v1231_v55 = vadd.f32 %v2691_v63, %v1089_v4  ;;  %v1390_v56 = vadd.f32 %v1351_v23, %v1248_v32 }
 0x129   : > { %v1088_v60 = vld [vmem:[#allocation3 + $0x30] sm:$0xff]  ;;  %v1251_v61 = vld [vmem:[#allocation3 + $0x18] sm:$0xff]  ;;  %v2705_v62 = vpop.f32.mrf.mxu0  ;;  %v1537_v0 = vpop.f32.mrf.mxu1 }
 0x12a   : > { %1239 = vst.msk [vmem:[#allocation3 + $0x38] sm:$0xff] %vm566_vm3, %v1231_v55  ;;  %1398 = vst.msk [vmem:[#allocation3] sm:$0xff] %vm566_vm3, %v1390_v56  ;;  %v1230_v7 = vadd.f32 %v1215_v14, %v1088_v60  ;;  %v1393_v8 = vadd.f32 %v2699_v31, %v1251_v61 }
 0x12b   : > { %v1250_v10 = vld [vmem:[#allocation3 + $0x10] sm:$0xff]  ;;  %v1381_v13 = vpop.f32.mrf.mxu0  ;;  %v2719_v19 = vpop.f32.mrf.mxu1 }
 0x12c   : > { %1238 = vst.msk [vmem:[#allocation3 + $0x30] sm:$0xff] %vm566_vm3, %v1230_v7  ;;  %1401 = vst.msk [vmem:[#allocation3 + $0x18] sm:$0xff] %vm566_vm3, %v1393_v8  ;;  %v1392_v26 = vadd.f32 %v1361_v42, %v1250_v10 }
 0x12d   : > { %v1253_v27 = vld [vmem:[#allocation3 + $0x28] sm:$0xff]  ;;  %v2724_v30 = vpop.f32.mrf.mxu0  ;;  %v1547_v33 = vpop.f32.mrf.mxu1 }
 0x12e   : > { %1400 = vst.msk [vmem:[#allocation3 + $0x10] sm:$0xff] %vm566_vm3, %v1392_v26  ;;  %v1395_v34 = vadd.f32 %v2702_v48, %v1253_v27 }
 0x12f   : > { %v1252_v36 = vld [vmem:[#allocation3 + $0x20] sm:$0xff]  ;;  %v1415_v40 = vld [vmem:[#allocation3 + $0x8] sm:$0xff]  ;;  %v1683_v21 = vpop.f32.mrf.mxu0  ;;  %v3632_v22 = vpop.f32.mrf.mxu1 }
 0x130   : > { %1403 = vst.msk [vmem:[#allocation3 + $0x28] sm:$0xff] %vm566_vm3, %v1395_v34  ;;  %v1394_v28 = vadd.f32 %v1371_v53, %v1252_v36  ;;  %v1557_v35 = vadd.f32 %v2710_v24, %v1415_v40 }
 0x131   : > { %v1255_v37 = vld [vmem:[#allocation3 + $0x38] sm:$0xff]  ;;  %v1414_v38 = vld [vmem:[#allocation3] sm:$0xff]  ;;  %v2727_v41 = vpop.f32.mrf.mxu0  ;;  %v3635_v47 = vpop.f32.mrf.mxu1 }
 0x132   : > { %1402 = vst.msk [vmem:[#allocation3 + $0x20] sm:$0xff] %vm566_vm3, %v1394_v28  ;;  %1565 = vst.msk [vmem:[#allocation3 + $0x8] sm:$0xff] %vm566_vm3, %v1557_v35  ;;  %v1397_v49 = vadd.f32 %v2705_v62, %v1255_v37  ;;  %v1556_v50 = vadd.f32 %v1517_v39, %v1414_v38 }
 0x133   : > { %v1254_v57 = vld [vmem:[#allocation3 + $0x30] sm:$0xff]  ;;  %v1417_v58 = vld [vmem:[#allocation3 + $0x18] sm:$0xff]  ;;  %v1693_v59 = vpop.f32.mrf.mxu0  ;;  %v3639_v63 = vpop.f32.mrf.mxu1 }
 0x134   : > { %1405 = vst.msk [vmem:[#allocation3 + $0x38] sm:$0xff] %vm566_vm3, %v1397_v49  ;;  %1564 = vst.msk [vmem:[#allocation3] sm:$0xff] %vm566_vm3, %v1556_v50  ;;  %v1396_v1 = vadd.f32 %v1381_v13, %v1254_v57  ;;  %v1559_v3 = vadd.f32 %v2713_v43, %v1417_v58 }
 0x135   : > { %v1416_v9 = vld [vmem:[#allocation3 + $0x10] sm:$0xff]  ;;  %v2730_v11 = vpop.f32.mrf.mxu0  ;;  %v3643_v12 = vpop.f32.mrf.mxu1 }
 0x136   : > { %1404 = vst.msk [vmem:[#allocation3 + $0x30] sm:$0xff] %vm566_vm3, %v1396_v1  ;;  %1567 = vst.msk [vmem:[#allocation3 + $0x18] sm:$0xff] %vm566_vm3, %v1559_v3  ;;  %v1558_v14 = vadd.f32 %v1527_v16, %v1416_v9 }
 0x137   : > { %v1419_v15 = vld [vmem:[#allocation3 + $0x28] sm:$0xff]  ;;  %v1703_v17 = vpop.f32.mrf.mxu0  ;;  %v3647_v18 = vpop.f32.mrf.mxu1 }
 0x138   : > { %1566 = vst.msk [vmem:[#allocation3 + $0x10] sm:$0xff] %vm566_vm3, %v1558_v14  ;;  %v1561_v20 = vadd.f32 %v2716_v54, %v1419_v15 }
 0x139   : > { %v1418_v23 = vld [vmem:[#allocation3 + $0x20] sm:$0xff]  ;;  %v1581_v24 = vld [vmem:[#allocation3 + $0x8] sm:$0xff]  ;;  %v2733_v25 = vpop.f32.mrf.mxu0  ;;  %v3653_v29 = vpop.f32.mrf.mxu1 }
 0x13a   : > { %1569 = vst.msk [vmem:[#allocation3 + $0x28] sm:$0xff] %vm566_vm3, %v1561_v20  ;;  %v1560_v5 = vadd.f32 %v1537_v0, %v1418_v23  ;;  %v1723_v31 = vadd.f32 %v2724_v30, %v1581_v24 }
 0x13b   : > { %v1421_v39 = vld [vmem:[#allocation3 + $0x38] sm:$0xff]  ;;  %v1580_v6 = vld [vmem:[#allocation3] sm:$0xff]  ;;  %v3657_v2 = vpop.f32.mrf.mxu1  ;;  %v1713_v46 = vpop.f32.mrf.mxu0 }
 0x13c   : > { %1568 = vst.msk [vmem:[#allocation3 + $0x20] sm:$0xff] %vm566_vm3, %v1560_v5  ;;  %1731 = vst.msk [vmem:[#allocation3 + $0x8] sm:$0xff] %vm566_vm3, %v1723_v31  ;;  %v1563_v42 = vadd.f32 %v2719_v19, %v1421_v39  ;;  %v1722_v43 = vadd.f32 %v1683_v21, %v1580_v6 }
 0x13d   : > { %v1420_v44 = vld [vmem:[#allocation3 + $0x30] sm:$0xff]  ;;  %v1583_v45 = vld [vmem:[#allocation3 + $0x18] sm:$0xff]  ;;  %v3661_v48 = vpop.f32.mrf.mxu1  ;;  %v2752_v4 = vpop.f32.mrf.mxu0 }
 0x13e   : > { %1571 = vst.msk [vmem:[#allocation3 + $0x38] sm:$0xff] %vm566_vm3, %v1563_v42  ;;  %1730 = vst.msk [vmem:[#allocation3] sm:$0xff] %vm566_vm3, %v1722_v43  ;;  %v1562_v16 = vadd.f32 %v1547_v33, %v1420_v44  ;;  %v1725_v51 = vadd.f32 %v2727_v41, %v1583_v45 }
 0x13f   : > { %v1582_v52 = vld [vmem:[#allocation3 + $0x10] sm:$0xff]  ;;  %v2766_v32 = vpop.f32.mrf.mxu1  ;;  %v3676_v62 = vpop.f32.mrf.mxu0 }
 0x140   : > { %1570 = vst.msk [vmem:[#allocation3 + $0x30] sm:$0xff] %vm566_vm3, %v1562_v16  ;;  %1733 = vst.msk [vmem:[#allocation3 + $0x18] sm:$0xff] %vm566_vm3, %v1725_v51  ;;  %v1724_v53 = vadd.f32 %v1693_v59, %v1582_v52 }
 0x141   : > { %2220 = vst.msk [vmem:[%s3669_s13 + $0x8] sm:$0xff] %vm566_vm3, %v2766_v32  ;;  %v1585_v54 = vld [vmem:[#allocation3 + $0x28] sm:$0xff]  ;;  %v2180_v55 = vpop.f32.mrf.mxu1  ;;  %v3687_v34 = vpop.f32.mrf.mxu0 }
 0x142   : > { %1732 = vst.msk [vmem:[#allocation3 + $0x10] sm:$0xff] %vm566_vm3, %v1724_v53  ;;  %v1727_v56 = vadd.f32 %v2730_v11, %v1585_v54  ;;  %2219 = vst.msk [vmem:[%s3669_s13] sm:$0xff] %vm566_vm3, %v2180_v55 }
 0x143   : > { %v1584_v60 = vld [vmem:[#allocation3 + $0x20] sm:$0xff]  ;;  %v1747_v61 = vld [vmem:[#allocation3 + $0x8] sm:$0xff]  ;;  %v2769_v0 = vpop.f32.mrf.mxu1  ;;  %v2025_v38 = vpop.f32.mrf.mxu0 }
 0x144   : > { %1735 = vst.msk [vmem:[#allocation3 + $0x28] sm:$0xff] %vm566_vm3, %v1727_v56  ;;  %v1726_v7 = vadd.f32 %v1703_v17, %v1584_v60  ;;  %v1889_v8 = vadd.f32 %v3632_v22, %v1747_v61  ;;  %2222 = vst.msk [vmem:[%s3669_s13 + $0x18] sm:$0xff] %vm566_vm3, %v2769_v0 }
 0x145   : > { %v1587_v10 = vld [vmem:[#allocation3 + $0x38] sm:$0xff]  ;;  %v1746_v13 = vld [vmem:[#allocation3] sm:$0xff]  ;;  %v2190_v19 = vpop.f32.mrf.mxu1  ;;  %v2758_v3 = vpop.f32.mrf.mxu0 }
 0x146   : > { %1734 = vst.msk [vmem:[#allocation3 + $0x20] sm:$0xff] %vm566_vm3, %v1726_v7  ;;  %1897 = vst.msk [vmem:[#allocation3 + $0x8] sm:$0xff] %vm566_vm3, %v1889_v8  ;;  %v1729_v26 = vadd.f32 %v2733_v25, %v1587_v10  ;;  %v1888_v27 = vadd.f32 %v3635_v47, %v1746_v13 }
 0x147   : > { %2221 = vst.msk [vmem:[%s3669_s13 + $0x10] sm:$0xff] %vm566_vm3, %v2190_v19  ;;  %v1586_v30 = vld [vmem:[#allocation3 + $0x30] sm:$0xff]  ;;  %v1749_v33 = vld [vmem:[#allocation3 + $0x18] sm:$0xff]  ;;  %v2772_v36 = vpop.f32.mrf.mxu1 }
 0x148   : > { %1737 = vst.msk [vmem:[#allocation3 + $0x38] sm:$0xff] %vm566_vm3, %v1729_v26  ;;  %1896 = vst.msk [vmem:[#allocation3] sm:$0xff] %vm566_vm3, %v1888_v27  ;;  %v1728_v40 = vadd.f32 %v1713_v46, %v1586_v30  ;;  %v1891_v21 = vadd.f32 %v3639_v63, %v1749_v33 }
 0x149   : > { %2224 = vst.msk [vmem:[%s3669_s13 + $0x28] sm:$0xff] %vm566_vm3, %v2772_v36  ;;  %v1748_v22 = vld [vmem:[#allocation3 + $0x10] sm:$0xff]  ;;  %v2200_v28 = vpop.f32.mrf.mxu1 }
 0x14a   : > { %1736 = vst.msk [vmem:[#allocation3 + $0x30] sm:$0xff] %vm566_vm3, %v1728_v40  ;;  %1899 = vst.msk [vmem:[#allocation3 + $0x18] sm:$0xff] %vm566_vm3, %v1891_v21  ;;  %v1890_v35 = vadd.f32 %v3643_v12, %v1748_v22 }
 0x14b   : > { %2223 = vst.msk [vmem:[%s3669_s13 + $0x20] sm:$0xff] %vm566_vm3, %v2200_v28  ;;  %v1751_v37 = vld [vmem:[#allocation3 + $0x28] sm:$0xff]  ;;  %v2775_v41 = vpop.f32.mrf.mxu1 }
 0x14c   : > { %1898 = vst.msk [vmem:[#allocation3 + $0x10] sm:$0xff] %vm566_vm3, %v1890_v35  ;;  %v1893_v47 = vadd.f32 %v3647_v18, %v1751_v37  ;;  %2226 = vst.msk [vmem:[%s3669_s13 + $0x38] sm:$0xff] %vm566_vm3, %v2775_v41 }
 0x14d   : > { %v1750_v49 = vld [vmem:[#allocation3 + $0x20] sm:$0xff]  ;;  %v1913_v50 = vld [vmem:[#allocation3 + $0x8] sm:$0xff]  ;;  %v2210_v57 = vpop.f32.mrf.mxu1 }
 0x14e   : > { %1901 = vst.msk [vmem:[#allocation3 + $0x28] sm:$0xff] %vm566_vm3, %v1893_v47  ;;  %v1892_v58 = vadd.f32 %v3653_v29, %v1750_v49  ;;  %v2055_v59 = vadd.f32 %v2752_v4, %v1913_v50  ;;  %2225 = vst.msk [vmem:[%s3669_s13 + $0x30] sm:$0xff] %vm566_vm3, %v2210_v57 }
 0x14f   : > { %v1753_v63 = vld [vmem:[#allocation3 + $0x38] sm:$0xff]  ;;  %v1912_v1 = vld [vmem:[#allocation3] sm:$0xff] }
 0x150   : > { %2852 = shalt.err (!%p2849_p5)
}
 0x151   : > { %s2853_s11 = scalar_lea.hbm %s3710_s19, 1024  ;;  %s2857_s18 = scalar_lea.hbm %s3830_s6, 2048 }
 0x152   : > { %p2854_p6 = scmp.ne.s32.totalorder %s3710_s19, %s2853_s11  ;;  %p2858_p10 = scmp.lt.s32.totalorder %s3710_s19, %s3830_s6 }
 0x153   : > { %p2859_p11 = scmp.lt.s32.totalorder %s2857_s18, %s2853_s11 }
 0x154   : > { %p2855_p7 = pnand %p2854_p6, %p3027_p4 }
 0x155   : > { %p2860_p12 = por %p2859_p11, %p2858_p10 }
 0x156   : > { %p2856_p9 = pneg %p2855_p7 }
 0x158   : > { %p2861_p13 = pnand %p2860_p12, %p2856_p9 }
 0x15a   : > { %2864 = shalt.err (!%p2861_p13)
}
 0x15b   : > { %s2949_s27 = smov 128   ;;  %s2950_s30 = smov 8   ;;  %1900 = vst.msk [vmem:[#allocation3 + $0x20] sm:$0xff] %vm566_vm3, %v1892_v58  ;;  %2063 = vst.msk [vmem:[#allocation3 + $0x8] sm:$0xff] %vm566_vm3, %v2055_v59  ;;  %v1895_v9 = vadd.f32 %v3657_v2, %v1753_v63  ;;  %v2054_v11 = vadd.f32 %v3676_v62, %v1912_v1  ;;  %v1752_v12 = vld [vmem:[#allocation3 + $0x30] sm:$0xff]  ;;  %v1915_v14 = vld [vmem:[#allocation3 + $0x18] sm:$0xff]  ;;  %v2035_v20 = vpop.f32.mrf.mxu0 }
 0x15c   : > { %2777 = dma.vmem_to_hbm [thread:$0]  (%p3027_p4), %s3712_s16, 1024, %s3710_s19, %s2233_s20, %s2949_s27, %s2949_s27, %s2950_s30   ;;  %v1894_v15 = vadd.f32 %v3661_v48, %v1752_v12  ;;  %v2057_v17 = vadd.f32 %v3687_v34, %v1915_v14  ;;  %v1914_v18 = vld [vmem:[#allocation3 + $0x10] sm:$0xff]  ;;  %v1917_v24 = vld [vmem:[#allocation3 + $0x28] sm:$0xff] }
 0x15d   : > { %1903 = vst.msk [vmem:[#allocation3 + $0x38] sm:$0xff] %vm566_vm3, %v1895_v9  ;;  %2062 = vst.msk [vmem:[#allocation3] sm:$0xff] %vm566_vm3, %v2054_v11  ;;  %v2056_v23 = vadd.f32 %v2025_v38, %v1914_v18  ;;  %v2059_v25 = vadd.f32 %v2758_v3, %v1917_v24  ;;  %v2761_v31 = vpop.f32.mrf.mxu0  ;;  %s290_s15 = scalar_lea.vmem [#allocation4], %s2407_s14  ;;  %s3834_s16 = sshll.u32 %s2937_s24, 10 }
 0x15e   : > { %1902 = vst.msk [vmem:[#allocation3 + $0x30] sm:$0xff] %vm566_vm3, %v1894_v15  ;;  %2065 = vst.msk [vmem:[#allocation3 + $0x18] sm:$0xff] %vm566_vm3, %v2057_v17  ;;  %s2247_s14 = sshll.u32 %s290_s15, 4  ;;  %s3773_s8 = scalar_lea.hbm %s3829_s5, %s3834_s16  ;;  %s3775_s14 = int_to_ptr.vmem [resolvable:$true] %s2247_s14 }
 0x15f   : > { %2064 = vst.msk [vmem:[#allocation3 + $0x10] sm:$0xff] %vm566_vm3, %v2056_v23  ;;  %2067 = vst.msk [vmem:[#allocation3 + $0x28] sm:$0xff] %vm566_vm3, %v2059_v25  ;;  %v2045_v45 = vpop.f32.mrf.mxu0  ;;  %s2228_s11 = scalar_lea.sflag [#allocation5], %s3650_s12  ;;  %s2865_s13 = scalar_lea.vmem %s3775_s14, 1024 }
 0x160   : > { %p2866_p0 = scmp.ne.s32.totalorder %s3775_s14, %s2865_s13  ;;  %s2951_s24 = smov [#allocation4]  }
 0x161   : > { %s2869_s17 = sshll.u32 %s2951_s24, 4  ;;  %s2870_s17 = int_to_ptr.vmem [resolvable:$false] %s2869_s17 }
 0x162   : > { %v2071_v29 = vld [vmem:[#allocation3 + $0x8] sm:$0xff]  ;;  %v1916_v5 = vld [vmem:[#allocation3 + $0x20] sm:$0xff]  ;;  %p2867_p1 = pnand %p2866_p0, %p3027_p4  ;;  %s2871_s18 = scalar_lea.vmem %s2870_s17, 2048 }
 0x163   : > { %v2058_v39 = vadd.f32 %v2035_v20, %v1916_v5  ;;  %2079 = vst.msk [vmem:[%s290_s15 + $0x8] sm:$0xff] %vm566_vm3, %v2071_v29  ;;  %p2872_p3 = scmp.lt.s32.totalorder %s3775_s14, %s2870_s17  ;;  %p2873_p5 = scmp.lt.s32.totalorder %s2871_s18, %s2865_s13 }
 0x164   : > { %v2070_v6 = vld [vmem:[#allocation3] sm:$0xff]  ;;  %v1919_v2 = vld [vmem:[#allocation3 + $0x38] sm:$0xff]  ;;  %p2868_p2 = pneg %p2867_p1 }
 0x165   : > { %2066 = vst.msk [vmem:[#allocation3 + $0x20] sm:$0xff] %vm566_vm3, %v2058_v39  ;;  %2078 = vst.msk [vmem:[%s290_s15] sm:$0xff] %vm566_vm3, %v2070_v6  ;;  %v2061_v42 = vadd.f32 %v2761_v31, %v1919_v2  ;;  %v2073_v43 = vld [vmem:[#allocation3 + $0x18] sm:$0xff]  ;;  %v1918_v44 = vld [vmem:[#allocation3 + $0x30] sm:$0xff]  ;;  %p2874_p6 = por %p2873_p5, %p2872_p3 }
 0x166   : > { %2081 = vst.msk [vmem:[%s290_s15 + $0x18] sm:$0xff] %vm566_vm3, %v2073_v43  ;;  %v2060_v46 = vadd.f32 %v2045_v45, %v1918_v44  ;;  %v2072_v48 = vld [vmem:[#allocation3 + $0x10] sm:$0xff]  ;;  %v2075_v16 = vld [vmem:[#allocation3 + $0x28] sm:$0xff] }
 0x167   : > { %2069 = vst.msk [vmem:[#allocation3 + $0x38] sm:$0xff] %vm566_vm3, %v2061_v42  ;;  %2080 = vst.msk [vmem:[%s290_s15 + $0x10] sm:$0xff] %vm566_vm3, %v2072_v48  ;;  %p2875_p7 = pnand %p2874_p6, %p2868_p2 }
 0x168   : > { %2068 = vst.msk [vmem:[#allocation3 + $0x30] sm:$0xff] %vm566_vm3, %v2060_v46  ;;  %2083 = vst.msk [vmem:[%s290_s15 + $0x28] sm:$0xff] %vm566_vm3, %v2075_v16 }
 0x16c   : > { %v2074_v51 = vld [vmem:[#allocation3 + $0x20] sm:$0xff] }
 0x16d   : > { %2082 = vst.msk [vmem:[%s290_s15 + $0x20] sm:$0xff] %vm566_vm3, %v2074_v51 }
 0x16e   : > { %v2077_v52 = vld [vmem:[#allocation3 + $0x38] sm:$0xff] }
 0x16f   : > { %2085 = vst.msk [vmem:[%s290_s15 + $0x38] sm:$0xff] %vm566_vm3, %v2077_v52  ;;  %v2076_v4 = vld [vmem:[#allocation3 + $0x30] sm:$0xff] }
 0x170   : > { %2084 = vst.msk [vmem:[%s290_s15 + $0x30] sm:$0xff] %vm566_vm3, %v2076_v4 }
 0x171   : > { %2878 = shalt.err (!%p2875_p7)
}
 0x172   : > { %s2879_s28 = scalar_lea.hbm %s3773_s8, 1024  ;;  %s2883_s16 = scalar_lea.hbm %s3829_s5, 2048 }
 0x173   : > { %p2880_p9 = scmp.ne.s32.totalorder %s3773_s8, %s2879_s28  ;;  %p2884_p12 = scmp.lt.s32.totalorder %s3773_s8, %s3829_s5 }
 0x174   : > { %p2885_p13 = scmp.lt.s32.totalorder %s2883_s16, %s2879_s28 }
 0x175   : > { %p2881_p10 = pnand %p2880_p9, %p3027_p4 }
 0x176   : > { %p2886_p0 = por %p2885_p13, %p2884_p12 }
 0x177   : > { %p2882_p11 = pneg %p2881_p10 }
 0x179   : > { %p2887_p1 = pnand %p2886_p0, %p2882_p11 }
 0x17b   : > { %2890 = shalt.err (!%p2887_p1)
}
 0x17c   : > { %2776 = dma.vmem_to_hbm [thread:$0]  (%p3027_p4), %s3775_s14, 1024, %s3773_s8, %s2228_s11, %s2949_s27, %s2949_s27, %s2950_s30  }
 0x17d PF: > { %p2787_p2 = scmp.ge.s32.totalorder %s2945_s26, 2  ;;  %s2279_s13 = sand.u32 1, %s2925_s21  }
 0x17e   : > { %s2280_s24 = scalar_lea.sflag [#allocation5], %s2279_s13 }
 0x17f   : > { %p2781_p3 = pnand %p2787_p2, %p3034_p8 }
 0x181   : > { %p2782_p5 = pneg %p2781_p3 }
 0x183   : > { %2916 = dma.done.wait (%p2782_p5), %s2280_s24, 1024  }
 0x184   : > { %2918 = vsyncadd (%p2782_p5), %s2280_s24, 4294966272  ;;  %s2289_s17 = scalar_lea.sflag [#allocation7], %s2279_s13 }
 0x185   : > { %2920 = dma.done.wait (%p2782_p5), %s2289_s17, 1024  }
 0x186   : > { %2922 = vsyncadd (%p2782_p5), %s2289_s17, 4294966272  ;;  %s23_s26 = sadd.s32 1, %s2945_s26   ;;  %s3835_s21 = smov %s2929_s22 }
 0x187   : > { %p20_p6 = scmp.ge.s32.totalorder %s23_s26, 4   ;;  %s3836_s22 = smov %s2933_s23 }
 0x188   : > { %s3837_s23 = smov %s3040_s10  ;;  %s3838_s24 = smov %s2941_s25 }
 0x189   : > { %s3839_s25 = smov %s3841_s29  ;;  %22 = sbr.rel (!%p20_p6) target bundleno = 6 (0x6), region = 114 }
 0x18e   :  { %2294 = vsyncpa [#allocation5], 1 }
 0x18f   :  { %2296 = vsyncpa [#allocation5 + $0x1], 1 }
 0x190   :  { %2297 = vsyncpa [#allocation7], 1 }
 0x191   :  { %2299 = vsyncpa [#allocation7 + $0x1], 1 }

</bundles_post_ra>
